<compile_context>
chip_gen: v7x
topology: tpu7x:2x2x1
jax: 0.10.0
libtpu: 0.0.40
codegen_flags: <defaults>
</compile_context>

<pallas_src>
import functools

import numpy as np
import jax
import jax.numpy as jnp
from jax import lax
from jax.experimental import pallas as pl
from jax.experimental.pallas import tpu as pltpu

# ---------------- config (mirrors the cfg dict consumed by PolicyGNN) --------
CFG = dict(
    use_value_critic=True,
    use_batch_norm=False,
    logit_normalizer=10.0,   # used only in step()/compute_probs, not forward()
    edge_feature_dim=6, node_feature_dim=5, global_feature_dim=4,
    edge_embedding_dim=16, node_embedding_dim=16, global_embedding_dim=8,
    edge_hidden_dim=32, node_hidden_dim=32, global_hidden_dim=32,
    edge_target_dim=16, node_target_dim=16, global_target_dim=8,
    edge_dim_out=1, value_embedding_dim=16,
    n_passes=2,
)

PARAM_ORDER = [
    'we', 'be', 'wn', 'bn', 'wg', 'bg',
    'w1', 'b1', 'w2', 'b2',
    'wm1', 'bm1', 'wm2', 'bm2', 'wm2b', 'bm2b',
    'wg1', 'bg1', 'wg2', 'bg2',
    'wd_t', 'bd', 'wv1', 'bv1', 'wv2_t', 'bv2',
]


# ---------------- deterministic parameter init (PyTorch Linear-style) --------
def _linear(key, fan_in, fan_out):
    kw, kb = jax.random.split(key)
    bound = 1.0 / np.sqrt(fan_in)
    w = jax.random.uniform(kw, (fan_in, fan_out), jnp.float32, -bound, bound)
    b = jax.random.uniform(kb, (1, fan_out), jnp.float32, -bound, bound)
    return w, b


def init_params(key, cfg):
    De, Dn, Dg = cfg['edge_embedding_dim'], cfg['node_embedding_dim'], cfg['global_embedding_dim']
    He, Hn, Hg = cfg['edge_hidden_dim'], cfg['node_hidden_dim'], cfg['global_hidden_dim']
    Te, Tn, Tg = cfg['edge_target_dim'], cfg['node_target_dim'], cfg['global_target_dim']
    Dv = cfg['value_embedding_dim']
    keys = jax.random.split(key, 12)
    p = {}
    # embedding MLPs (Linear + LeakyReLU)
    p['we'], p['be'] = _linear(keys[0], cfg['edge_feature_dim'], De)
    p['wn'], p['bn'] = _linear(keys[1], cfg['node_feature_dim'], Dn)
    p['wg'], p['bg'] = _linear(keys[2], cfg['global_feature_dim'], Dg)
    # EdgeModel: Lin(2*Dn + De + Dg, He) -> LeakyReLU -> Lin(He, Te)  (FUSED)
    p['w1'], p['b1'] = _linear(keys[3], 2 * Dn + De + Dg, He)
    p['w2'], p['b2'] = _linear(keys[4], He, Te)
    # NodeModel mlp1: Lin(Dn + Te, Hn) -> LeakyReLU                  (FUSED)
    p['wm1'], p['bm1'] = _linear(keys[5], Dn + Te, Hn)
    # NodeModel mlp2: Lin(Dn + Hn + Dg, Hn) -> LeakyReLU -> Lin(Hn, Tn)
    p['wm2'], p['bm2'] = _linear(keys[6], Dn + Hn + Dg, Hn)
    p['wm2b'], p['bm2b'] = _linear(keys[7], Hn, Tn)
    # GlobalModel: Lin(Dg + Dn, Hg) -> LeakyReLU -> Lin(Hg, Tg)      (FUSED)
    p['wg1'], p['bg1'] = _linear(keys[8], Dg + Dn, Hg)
    p['wg2'], p['bg2'] = _linear(keys[9], Hg, Tg)
    # edge decoder (stored transposed: the kernel computes lane-dense (1,E))
    wd, p['bd'] = _linear(keys[10], Te, cfg['edge_dim_out'])
    p['wd_t'] = wd.T                                    # (1, Te)
    # value head: Lin(Tg, Dv) -> LeakyReLU -> Lin(Dv, 1)
    kv1, kv2 = jax.random.split(keys[11])
    p['wv1'], p['bv1'] = _linear(kv1, Tg, Dv)
    wv2, p['bv2'] = _linear(kv2, Dv, 1)
    p['wv2_t'] = wv2.T                                  # (1, Dv)
    return p


# ---------------- the Pallas kernel ------------------------------------------
def _policy_gnn_kernel(*refs, n_passes, mxu_dtype):
    (edge_attr_ref, x_ref, u_ref,
     row_c_ref, col_c_ref, col_r_ref, bat_e_ref, bat_nc_ref, bat_nr_ref,
     inv_deg_ref, inv_cnt_ref,
     we_ref, be_ref, wn_ref, bn_ref, wg_ref, bg_ref,
     w1_ref, b1_ref, w2_ref, b2_ref,
     wm1_ref, bm1_ref, wm2_ref, bm2_ref, wm2b_ref, bm2b_ref,
     wg1_ref, bg1_ref, wg2_ref, bg2_ref,
     wdt_ref, bd_ref, wv1_ref, bv1_ref, wv2t_ref, bv2_ref,
     edge_out_ref, value_out_ref) = refs

    f32 = jnp.float32
    E = edge_attr_ref.shape[0]
    N = x_ref.shape[0]
    B = u_ref.shape[0]

    def leaky(v):                       # LeakyReLU, negative_slope=0.01 (f32 VPU)
        return jnp.where(v > 0, v, 0.01 * v)

    def mm(a, b):                       # MXU matmul, f32 accumulation
        return jnp.dot(a.astype(mxu_dtype), b.astype(mxu_dtype),
                       preferred_element_type=f32)

    cast = lambda a: a.astype(mxu_dtype)

    # ---- hoisted weight / bias reads (kept out of the message-passing loop) ----
    we, be = cast(we_ref[...]), be_ref[...]
    wn, bn = cast(wn_ref[...]), bn_ref[...]
    wg, bg = cast(wg_ref[...]), bg_ref[...]
    w1, b1 = cast(w1_ref[...]), b1_ref[...]
    w2, b2 = cast(w2_ref[...]), b2_ref[...]
    wm1, bm1 = cast(wm1_ref[...]), bm1_ref[...]
    wm2, bm2 = cast(wm2_ref[...]), bm2_ref[...]
    wm2b, bm2b = cast(wm2b_ref[...]), bm2b_ref[...]
    wg1, bg1 = cast(wg1_ref[...]), bg1_ref[...]
    wg2, bg2 = cast(wg2_ref[...]), bg2_ref[...]
    wdt, bd = cast(wdt_ref[...]), bd_ref[...]
    wv1, bv1 = cast(wv1_ref[...]), bv1_ref[...]
    wv2t, bv2 = cast(wv2t_ref[...]), bv2_ref[...]

    # ---- rebuild one-hot gather / 0-1 scatter matrices on-chip from indices ----
    one, zero = f32(1.0), f32(0.0)
    node_ids_e = lax.broadcasted_iota(jnp.int32, (E, N), 1)      # node id on lanes
    g_src = cast(jnp.where(node_ids_e == row_c_ref[...], one, zero))   # (E,N): x[row]
    g_dst = cast(jnp.where(node_ids_e == col_c_ref[...], one, zero))   # (E,N): x[col]
    node_ids_n = lax.broadcasted_iota(jnp.int32, (N, E), 0)      # node id on sublanes
    scat_col = cast(jnp.where(node_ids_n == col_r_ref[...], one, zero))  # (N,E) scatter(col)
    graph_ids_e = lax.broadcasted_iota(jnp.int32, (E, B), 1)
    g_ube = cast(jnp.where(graph_ids_e == bat_e_ref[...], one, zero))    # (E,B): u[batch[row]]
    graph_ids_n = lax.broadcasted_iota(jnp.int32, (N, B), 1)
    g_ubn = cast(jnp.where(graph_ids_n == bat_nc_ref[...], one, zero))   # (N,B): u[batch]
    graph_ids_b = lax.broadcasted_iota(jnp.int32, (B, N), 0)
    scat_bat = cast(jnp.where(graph_ids_b == bat_nr_ref[...], one, zero))  # (B,N) scatter(batch)
    inv_deg = inv_deg_ref[...]          # (N,1) 1/deg   -> mean applied post-matmul, f32
    inv_cnt = inv_cnt_ref[...]          # (B,1) 1/count

    # ---- embedding MLPs (Linear + LeakyReLU) ----
    e = leaky(mm(edge_attr_ref[...], we) + be)
    x = leaky(mm(x_ref[...], wn) + bn)
    u = leaky(mm(u_ref[...], wg) + bg)

    # ---- n_passes of MetaLayer message passing ----
    def one_pass(_, carry):
        e, x, u = carry
        src = mm(g_src, x)                       # x[row]
        dst = mm(g_dst, x)                       # x[col]
        u_e = mm(g_ube, u)                       # u[batch[row]]
        # EdgeModel: one fused matmul on cat([src, dst, e, u_e])
        h = leaky(mm(jnp.concatenate([src, dst, e, u_e], axis=-1), w1) + b1)
        e = mm(h, w2) + b2
        # NodeModel: mlp1(cat([x[row], e])) -> scatter_mean(col) -> mlp2(cat([x, agg, u_n]))
        m = leaky(mm(jnp.concatenate([src, e], axis=-1), wm1) + bm1)
        agg = mm(scat_col, m) * inv_deg          # scatter_mean over col
        u_n = mm(g_ubn, u)                       # u[batch]
        h2 = leaky(mm(jnp.concatenate([x, agg, u_n], axis=-1), wm2) + bm2)
        x = mm(h2, wm2b) + bm2b
        # GlobalModel: MLP(cat([u, scatter_mean(x, batch)]))
        x_mean = mm(scat_bat, x) * inv_cnt
        hg = leaky(mm(jnp.concatenate([u, x_mean], axis=-1), wg1) + bg1)
        u = mm(hg, wg2) + bg2
        return e, x, u

    e, x, u = lax.fori_loop(0, n_passes, one_pass, (e, x, u), unroll=True)

    # ---- decoders, computed transposed so E / B land on the lane axis ----
    edge_out_ref[...] = mm(wdt, e.T) + bd                       # (1, E)
    hv = leaky(mm(u, wv1) + bv1)                                # (B, Dv)
    value_out_ref[...] = mm(wv2t, hv.T) + bv2                   # (1, B)


# ---------------- cost estimate (hint for XLA around a small kernel) ----------
def _cost_estimate(inputs, E, N, B, cfg, n_passes):
    De, Dn, Dg = cfg['edge_embedding_dim'], cfg['node_embedding_dim'], cfg['global_embedding_dim']
    He, Hn, Hg = cfg['edge_hidden_dim'], cfg['node_hidden_dim'], cfg['global_hidden_dim']
    Te, Tn, Tg = cfg['edge_target_dim'], cfg['node_target_dim'], cfg['global_target_dim']
    Dv = cfg['value_embedding_dim']
    emb = (E * cfg['edge_feature_dim'] * De + N * cfg['node_feature_dim'] * Dn
           + B * cfg['global_feature_dim'] * Dg)
    per_pass = (2 * E * N * Dn + E * B * Dg
                + E * (2 * Dn + De + Dg) * He + E * He * Te
                + E * (Dn + Te) * Hn + N * E * Hn
                + N * B * Dg + N * (Dn + Hn + Dg) * Hn + N * Hn * Tn
                + B * N * Tn + B * (Dg + Dn) * Hg + B * Hg * Tg)
    dec = E * Te + B * Tg * Dv + B * Dv
    flops = 2 * (emb + n_passes * per_pass + dec)
    bytes_accessed = sum(int(np.prod(a.shape)) * a.dtype.itemsize for a in inputs) + 4 * (E + B)
    return pl.CostEstimate(flops=int(flops), transcendentals=0,
                           bytes_accessed=int(bytes_accessed))


# ---------------- wrapper: tiny index/scale vectors + pallas_call -------------
def policy_gnn_forward(params, x, edge_attr, u, edge_index, batch, n_passes,
                       mxu_dtype=jnp.float32):
    f32 = jnp.float32
    N, E, B = x.shape[0], edge_attr.shape[0], u.shape[0]
    row = edge_index[0].astype(jnp.int32)
    col = edge_index[1].astype(jnp.int32)
    batch = batch.astype(jnp.int32)

    # Only tiny index / scale vectors cross HBM; the dense one-hot matrices are
    # rebuilt on-chip (removes the O(E*N)/O(B*N) f32 gather matrices from HBM/DMA).
    row_c = row.reshape(E, 1)
    col_c = col.reshape(E, 1)
    col_r = col.reshape(1, E)
    bat_e = batch[row].reshape(E, 1)
    bat_nc = batch.reshape(N, 1)
    bat_nr = batch.reshape(1, N)
    deg = jnp.zeros((N,), f32).at[col].add(1.0)
    inv_deg = (1.0 / jnp.maximum(deg, 1.0)).reshape(N, 1)
    cnt = jnp.zeros((B,), f32).at[batch].add(1.0)
    inv_cnt = (1.0 / jnp.maximum(cnt, 1.0)).reshape(B, 1)

    inputs = [edge_attr.astype(f32), x.astype(f32), u.astype(f32),
              row_c, col_c, col_r, bat_e, bat_nc, bat_nr, inv_deg, inv_cnt]
    inputs += [params[k] for k in PARAM_ORDER]

    # lane-dense outputs: (1,E)/(1,B) with E,B on the lane axis; reshaped to the
    # PyTorch (E,1)/(B,1) layout outside the kernel.
    out_shape = (jax.ShapeDtypeStruct((1, E), f32),
                 jax.ShapeDtypeStruct((1, B), f32))

    kernel = functools.partial(_policy_gnn_kernel, n_passes=n_passes, mxu_dtype=mxu_dtype)
    vmem = pl.BlockSpec(memory_space=pltpu.MemorySpace.VMEM)
    edge_t, value_t = pl.pallas_call(
        kernel,
        out_shape=out_shape,
        in_specs=[vmem] * len(inputs),
        out_specs=(vmem, vmem),
        compiler_params=pltpu.CompilerParams(vmem_limit_bytes=32 * 1024 * 1024),
        cost_estimate=_cost_estimate(inputs, E, N, B, CFG, n_passes),
    )(*inputs)
    return edge_t.T, value_t.T                                  # (E,1), (B,1)


# ---------------- pure-JAX reference (gather / segment ops) -------------------
def reference_forward(p, x, edge_attr, u, edge_index, batch, n_passes):
    def leaky(v):
        return jnp.where(v > 0, v, 0.01 * v)

    row, col = edge_index[0], edge_index[1]
    N, B = x.shape[0], u.shape[0]
    e = leaky(edge_attr @ p['we'] + p['be'])
    xx = leaky(x @ p['wn'] + p['bn'])
    uu = leaky(u @ p['wg'] + p['bg'])
    for _ in range(n_passes):
        src, dst, u_e = xx[row], xx[col], uu[batch[row]]
        h = leaky(jnp.concatenate([src, dst, e, u_e], axis=-1) @ p['w1'] + p['b1'])
        e = h @ p['w2'] + p['b2']
        m = leaky(jnp.concatenate([src, e], axis=-1) @ p['wm1'] + p['bm1'])
        s = jax.ops.segment_sum(m, col, num_segments=N)
        c = jax.ops.segment_sum(jnp.ones((m.shape[0], 1)), col, num_segments=N)
        agg = s / jnp.maximum(c, 1.0)
        u_n = uu[batch]
        h2 = leaky(jnp.concatenate([xx, agg, u_n], axis=-1) @ p['wm2'] + p['bm2'])
        xx = h2 @ p['wm2b'] + p['bm2b']
        xs = jax.ops.segment_sum(xx, batch, num_segments=B)
        xc = jax.ops.segment_sum(jnp.ones((N, 1)), batch, num_segments=B)
        x_mean = xs / jnp.maximum(xc, 1.0)
        hg = leaky(jnp.concatenate([uu, x_mean], axis=-1) @ p['wg1'] + p['bg1'])
        uu = hg @ p['wg2'] + p['bg2']
    edge_out = e @ p['wd_t'].T + p['bd']
    value_out = leaky(uu @ p['wv1'] + p['bv1']) @ p['wv2_t'].T + p['bv2']
    return edge_out, value_out


# ---------------- main --------------------------------------------------------
if __name__ == "__main__":
    key = jax.random.PRNGKey(0)
    N, E, B = 16, 32, 2                    # nodes, edges, graphs in batch
    npg, epg = N // B, E // B
    batch = jnp.repeat(jnp.arange(B, dtype=jnp.int32), npg)

    k1, k2, k3, k4, k5, kp = jax.random.split(key, 6)
    x = jax.random.normal(k1, (N, CFG['node_feature_dim']), jnp.float32)
    edge_attr = jax.random.normal(k2, (E, CFG['edge_feature_dim']), jnp.float32)
    u = jax.random.normal(k3, (B, CFG['global_feature_dim']), jnp.float32)

    rows, cols = [], []
    for g in range(B):      # edges stay within their own graph
        rows.append(jax.random.randint(jax.random.fold_in(k4, g), (epg,), 0, npg) + g * npg)
        cols.append(jax.random.randint(jax.random.fold_in(k5, g), (epg,), 0, npg) + g * npg)
    edge_index = jnp.stack([jnp.concatenate(rows), jnp.concatenate(cols)]).astype(jnp.int32)

    params = init_params(kp, CFG)

    ref_e, ref_v = reference_forward(
        params, x, edge_attr, u, edge_index, batch, CFG['n_passes'])

    # f32 MXU path: same math as the reference -> tight tolerance.
    edge_out, value_out = policy_gnn_forward(
        params, x, edge_attr, u, edge_index, batch, CFG['n_passes'],
        mxu_dtype=jnp.float32)
    jax.block_until_ready((edge_out, value_out))
    np.testing.assert_allclose(np.asarray(edge_out), np.asarray(ref_e), rtol=1e-4, atol=1e-4)
    np.testing.assert_allclose(np.asarray(value_out), np.asarray(ref_v), rtol=1e-4, atol=1e-4)

    # bf16 MXU path (bf16 operands, f32 accumulation, f32 element-wise) -> bf16 tolerance.
    edge_bf, value_bf = policy_gnn_forward(
        params, x, edge_attr, u, edge_index, batch, CFG['n_passes'],
        mxu_dtype=jnp.bfloat16)
    jax.block_until_ready((edge_bf, value_bf))
    np.testing.assert_allclose(np.asarray(edge_bf), np.asarray(ref_e), rtol=5e-2, atol=5e-2)
    np.testing.assert_allclose(np.asarray(value_bf), np.asarray(ref_v), rtol=5e-2, atol=5e-2)

    print("KERNEL_OK")
</pallas_src>

<mosaic_0001>
module attributes {stable_mosaic.version = 11 : i64} {
  func.func @_policy_gnn_kernel(%arg0: memref<32x6xf32, #tpu.memory_space<vmem>>, %arg1: memref<16x5xf32, #tpu.memory_space<vmem>>, %arg2: memref<2x4xf32, #tpu.memory_space<vmem>>, %arg3: memref<32x1xi32, #tpu.memory_space<vmem>>, %arg4: memref<32x1xi32, #tpu.memory_space<vmem>>, %arg5: memref<1x32xi32, #tpu.memory_space<vmem>>, %arg6: memref<32x1xi32, #tpu.memory_space<vmem>>, %arg7: memref<16x1xi32, #tpu.memory_space<vmem>>, %arg8: memref<1x16xi32, #tpu.memory_space<vmem>>, %arg9: memref<16x1xf32, #tpu.memory_space<vmem>>, %arg10: memref<2x1xf32, #tpu.memory_space<vmem>>, %arg11: memref<6x16xf32, #tpu.memory_space<vmem>>, %arg12: memref<1x16xf32, #tpu.memory_space<vmem>>, %arg13: memref<5x16xf32, #tpu.memory_space<vmem>>, %arg14: memref<1x16xf32, #tpu.memory_space<vmem>>, %arg15: memref<4x8xf32, #tpu.memory_space<vmem>>, %arg16: memref<1x8xf32, #tpu.memory_space<vmem>>, %arg17: memref<56x32xf32, #tpu.memory_space<vmem>>, %arg18: memref<1x32xf32, #tpu.memory_space<vmem>>, %arg19: memref<32x16xf32, #tpu.memory_space<vmem>>, %arg20: memref<1x16xf32, #tpu.memory_space<vmem>>, %arg21: memref<32x32xf32, #tpu.memory_space<vmem>>, %arg22: memref<1x32xf32, #tpu.memory_space<vmem>>, %arg23: memref<56x32xf32, #tpu.memory_space<vmem>>, %arg24: memref<1x32xf32, #tpu.memory_space<vmem>>, %arg25: memref<32x16xf32, #tpu.memory_space<vmem>>, %arg26: memref<1x16xf32, #tpu.memory_space<vmem>>, %arg27: memref<24x32xf32, #tpu.memory_space<vmem>>, %arg28: memref<1x32xf32, #tpu.memory_space<vmem>>, %arg29: memref<32x8xf32, #tpu.memory_space<vmem>>, %arg30: memref<1x8xf32, #tpu.memory_space<vmem>>, %arg31: memref<1x16xf32, #tpu.memory_space<vmem>>, %arg32: memref<1x1xf32, #tpu.memory_space<vmem>>, %arg33: memref<8x16xf32, #tpu.memory_space<vmem>>, %arg34: memref<1x16xf32, #tpu.memory_space<vmem>>, %arg35: memref<1x16xf32, #tpu.memory_space<vmem>>, %arg36: memref<1x1xf32, #tpu.memory_space<vmem>>, %arg37: memref<1x32xf32, #tpu.memory_space<vmem>>, %arg38: memref<1x2xf32, #tpu.memory_space<vmem>>) attributes {dimension_semantics = [], scalar_prefetch = 0 : i64, scratch_operands = 0 : i64, tpu.core_type = #tpu.core_type<tc>} {
    %c0 = arith.constant 0 : index
    %c0_0 = arith.constant 0 : index
    %0 = vector.load %arg11[%c0, %c0_0] : memref<6x16xf32, #tpu.memory_space<vmem>>, vector<6x16xf32>
    %c0_1 = arith.constant 0 : index
    %c0_2 = arith.constant 0 : index
    %1 = vector.load %arg12[%c0_1, %c0_2] : memref<1x16xf32, #tpu.memory_space<vmem>>, vector<1x16xf32>
    %c0_3 = arith.constant 0 : index
    %c0_4 = arith.constant 0 : index
    %2 = vector.load %arg13[%c0_3, %c0_4] : memref<5x16xf32, #tpu.memory_space<vmem>>, vector<5x16xf32>
    %c0_5 = arith.constant 0 : index
    %c0_6 = arith.constant 0 : index
    %3 = vector.load %arg14[%c0_5, %c0_6] : memref<1x16xf32, #tpu.memory_space<vmem>>, vector<1x16xf32>
    %c0_7 = arith.constant 0 : index
    %c0_8 = arith.constant 0 : index
    %4 = vector.load %arg15[%c0_7, %c0_8] : memref<4x8xf32, #tpu.memory_space<vmem>>, vector<4x8xf32>
    %c0_9 = arith.constant 0 : index
    %c0_10 = arith.constant 0 : index
    %5 = vector.load %arg16[%c0_9, %c0_10] : memref<1x8xf32, #tpu.memory_space<vmem>>, vector<1x8xf32>
    %c0_11 = arith.constant 0 : index
    %c0_12 = arith.constant 0 : index
    %6 = vector.load %arg17[%c0_11, %c0_12] : memref<56x32xf32, #tpu.memory_space<vmem>>, vector<56x32xf32>
    %c0_13 = arith.constant 0 : index
    %c0_14 = arith.constant 0 : index
    %7 = vector.load %arg18[%c0_13, %c0_14] : memref<1x32xf32, #tpu.memory_space<vmem>>, vector<1x32xf32>
    %c0_15 = arith.constant 0 : index
    %c0_16 = arith.constant 0 : index
    %8 = vector.load %arg19[%c0_15, %c0_16] : memref<32x16xf32, #tpu.memory_space<vmem>>, vector<32x16xf32>
    %c0_17 = arith.constant 0 : index
    %c0_18 = arith.constant 0 : index
    %9 = vector.load %arg20[%c0_17, %c0_18] : memref<1x16xf32, #tpu.memory_space<vmem>>, vector<1x16xf32>
    %c0_19 = arith.constant 0 : index
    %c0_20 = arith.constant 0 : index
    %10 = vector.load %arg21[%c0_19, %c0_20] : memref<32x32xf32, #tpu.memory_space<vmem>>, vector<32x32xf32>
    %c0_21 = arith.constant 0 : index
    %c0_22 = arith.constant 0 : index
    %11 = vector.load %arg22[%c0_21, %c0_22] : memref<1x32xf32, #tpu.memory_space<vmem>>, vector<1x32xf32>
    %c0_23 = arith.constant 0 : index
    %c0_24 = arith.constant 0 : index
    %12 = vector.load %arg23[%c0_23, %c0_24] : memref<56x32xf32, #tpu.memory_space<vmem>>, vector<56x32xf32>
    %c0_25 = arith.constant 0 : index
    %c0_26 = arith.constant 0 : index
    %13 = vector.load %arg24[%c0_25, %c0_26] : memref<1x32xf32, #tpu.memory_space<vmem>>, vector<1x32xf32>
    %c0_27 = arith.constant 0 : index
    %c0_28 = arith.constant 0 : index
    %14 = vector.load %arg25[%c0_27, %c0_28] : memref<32x16xf32, #tpu.memory_space<vmem>>, vector<32x16xf32>
    %c0_29 = arith.constant 0 : index
    %c0_30 = arith.constant 0 : index
    %15 = vector.load %arg26[%c0_29, %c0_30] : memref<1x16xf32, #tpu.memory_space<vmem>>, vector<1x16xf32>
    %c0_31 = arith.constant 0 : index
    %c0_32 = arith.constant 0 : index
    %16 = vector.load %arg27[%c0_31, %c0_32] : memref<24x32xf32, #tpu.memory_space<vmem>>, vector<24x32xf32>
    %c0_33 = arith.constant 0 : index
    %c0_34 = arith.constant 0 : index
    %17 = vector.load %arg28[%c0_33, %c0_34] : memref<1x32xf32, #tpu.memory_space<vmem>>, vector<1x32xf32>
    %c0_35 = arith.constant 0 : index
    %c0_36 = arith.constant 0 : index
    %18 = vector.load %arg29[%c0_35, %c0_36] : memref<32x8xf32, #tpu.memory_space<vmem>>, vector<32x8xf32>
    %c0_37 = arith.constant 0 : index
    %c0_38 = arith.constant 0 : index
    %19 = vector.load %arg30[%c0_37, %c0_38] : memref<1x8xf32, #tpu.memory_space<vmem>>, vector<1x8xf32>
    %c0_39 = arith.constant 0 : index
    %c0_40 = arith.constant 0 : index
    %20 = vector.load %arg31[%c0_39, %c0_40] : memref<1x16xf32, #tpu.memory_space<vmem>>, vector<1x16xf32>
    %c0_41 = arith.constant 0 : index
    %c0_42 = arith.constant 0 : index
    %21 = vector.load %arg32[%c0_41, %c0_42] : memref<1x1xf32, #tpu.memory_space<vmem>>, vector<1x1xf32>
    %c0_43 = arith.constant 0 : index
    %c0_44 = arith.constant 0 : index
    %22 = vector.load %arg33[%c0_43, %c0_44] : memref<8x16xf32, #tpu.memory_space<vmem>>, vector<8x16xf32>
    %c0_45 = arith.constant 0 : index
    %c0_46 = arith.constant 0 : index
    %23 = vector.load %arg34[%c0_45, %c0_46] : memref<1x16xf32, #tpu.memory_space<vmem>>, vector<1x16xf32>
    %c0_47 = arith.constant 0 : index
    %c0_48 = arith.constant 0 : index
    %24 = vector.load %arg35[%c0_47, %c0_48] : memref<1x16xf32, #tpu.memory_space<vmem>>, vector<1x16xf32>
    %c0_49 = arith.constant 0 : index
    %c0_50 = arith.constant 0 : index
    %25 = vector.load %arg36[%c0_49, %c0_50] : memref<1x1xf32, #tpu.memory_space<vmem>>, vector<1x1xf32>
    %26 = tpu.iota {dimensions = array<i32: 1>} : vector<32x16xi32>
    %c0_51 = arith.constant 0 : index
    %c0_52 = arith.constant 0 : index
    %27 = vector.load %arg3[%c0_51, %c0_52] : memref<32x1xi32, #tpu.memory_space<vmem>>, vector<32x1xi32>
    %28 = vector.broadcast %27 : vector<32x1xi32> to vector<32x16xi32>
    %29 = arith.cmpi eq, %26, %28 : vector<32x16xi32>
    %cst = arith.constant 1.000000e+00 : f32
    %cst_53 = arith.constant 0.000000e+00 : f32
    %30 = vector.broadcast %cst : f32 to vector<32x16xf32>
    %31 = vector.broadcast %cst_53 : f32 to vector<32x16xf32>
    %32 = arith.select %29, %30, %31 : vector<32x16xi1>, vector<32x16xf32>
    %c0_54 = arith.constant 0 : index
    %c0_55 = arith.constant 0 : index
    %33 = vector.load %arg4[%c0_54, %c0_55] : memref<32x1xi32, #tpu.memory_space<vmem>>, vector<32x1xi32>
    %34 = vector.broadcast %33 : vector<32x1xi32> to vector<32x16xi32>
    %35 = arith.cmpi eq, %26, %34 : vector<32x16xi32>
    %cst_56 = arith.constant 1.000000e+00 : f32
    %cst_57 = arith.constant 0.000000e+00 : f32
    %36 = vector.broadcast %cst_56 : f32 to vector<32x16xf32>
    %37 = vector.broadcast %cst_57 : f32 to vector<32x16xf32>
    %38 = arith.select %35, %36, %37 : vector<32x16xi1>, vector<32x16xf32>
    %39 = tpu.iota {dimensions = array<i32: 0>} : vector<16x32xi32>
    %c0_58 = arith.constant 0 : index
    %c0_59 = arith.constant 0 : index
    %40 = vector.load %arg5[%c0_58, %c0_59] : memref<1x32xi32, #tpu.memory_space<vmem>>, vector<1x32xi32>
    %41 = vector.broadcast %40 : vector<1x32xi32> to vector<16x32xi32>
    %42 = arith.cmpi eq, %39, %41 : vector<16x32xi32>
    %cst_60 = arith.constant 1.000000e+00 : f32
    %cst_61 = arith.constant 0.000000e+00 : f32
    %43 = vector.broadcast %cst_60 : f32 to vector<16x32xf32>
    %44 = vector.broadcast %cst_61 : f32 to vector<16x32xf32>
    %45 = arith.select %42, %43, %44 : vector<16x32xi1>, vector<16x32xf32>
    %46 = tpu.iota {dimensions = array<i32: 1>} : vector<32x2xi32>
    %c0_62 = arith.constant 0 : index
    %c0_63 = arith.constant 0 : index
    %47 = vector.load %arg6[%c0_62, %c0_63] : memref<32x1xi32, #tpu.memory_space<vmem>>, vector<32x1xi32>
    %48 = vector.broadcast %47 : vector<32x1xi32> to vector<32x2xi32>
    %49 = arith.cmpi eq, %46, %48 : vector<32x2xi32>
    %cst_64 = arith.constant 1.000000e+00 : f32
    %cst_65 = arith.constant 0.000000e+00 : f32
    %50 = vector.broadcast %cst_64 : f32 to vector<32x2xf32>
    %51 = vector.broadcast %cst_65 : f32 to vector<32x2xf32>
    %52 = arith.select %49, %50, %51 : vector<32x2xi1>, vector<32x2xf32>
    %53 = tpu.iota {dimensions = array<i32: 1>} : vector<16x2xi32>
    %c0_66 = arith.constant 0 : index
    %c0_67 = arith.constant 0 : index
    %54 = vector.load %arg7[%c0_66, %c0_67] : memref<16x1xi32, #tpu.memory_space<vmem>>, vector<16x1xi32>
    %55 = vector.broadcast %54 : vector<16x1xi32> to vector<16x2xi32>
    %56 = arith.cmpi eq, %53, %55 : vector<16x2xi32>
    %cst_68 = arith.constant 1.000000e+00 : f32
    %cst_69 = arith.constant 0.000000e+00 : f32
    %57 = vector.broadcast %cst_68 : f32 to vector<16x2xf32>
    %58 = vector.broadcast %cst_69 : f32 to vector<16x2xf32>
    %59 = arith.select %56, %57, %58 : vector<16x2xi1>, vector<16x2xf32>
    %60 = tpu.iota {dimensions = array<i32: 0>} : vector<2x16xi32>
    %c0_70 = arith.constant 0 : index
    %c0_71 = arith.constant 0 : index
    %61 = vector.load %arg8[%c0_70, %c0_71] : memref<1x16xi32, #tpu.memory_space<vmem>>, vector<1x16xi32>
    %62 = vector.broadcast %61 : vector<1x16xi32> to vector<2x16xi32>
    %63 = arith.cmpi eq, %60, %62 : vector<2x16xi32>
    %cst_72 = arith.constant 1.000000e+00 : f32
    %cst_73 = arith.constant 0.000000e+00 : f32
    %64 = vector.broadcast %cst_72 : f32 to vector<2x16xf32>
    %65 = vector.broadcast %cst_73 : f32 to vector<2x16xf32>
    %66 = arith.select %63, %64, %65 : vector<2x16xi1>, vector<2x16xf32>
    %c0_74 = arith.constant 0 : index
    %c0_75 = arith.constant 0 : index
    %67 = vector.load %arg9[%c0_74, %c0_75] : memref<16x1xf32, #tpu.memory_space<vmem>>, vector<16x1xf32>
    %c0_76 = arith.constant 0 : index
    %c0_77 = arith.constant 0 : index
    %68 = vector.load %arg10[%c0_76, %c0_77] : memref<2x1xf32, #tpu.memory_space<vmem>>, vector<2x1xf32>
    %c0_78 = arith.constant 0 : index
    %c0_79 = arith.constant 0 : index
    %69 = vector.load %arg0[%c0_78, %c0_79] : memref<32x6xf32, #tpu.memory_space<vmem>>, vector<32x6xf32>
    %cst_80 = arith.constant dense<0.000000e+00> : vector<32x16xf32>
    %70 = tpu.matmul %69, %0, %cst_80 {dimension_numbers = #tpu.dot_dimension_numbers<[1], [0], [0], [1], [0, 0, 1, 1], [], []>} : vector<32x6xf32>, vector<6x16xf32>, vector<32x16xf32> -> vector<32x16xf32>
    %71 = vector.broadcast %1 : vector<1x16xf32> to vector<32x16xf32>
    %72 = arith.addf %70, %71 : vector<32x16xf32>
    %cst_81 = arith.constant 0.000000e+00 : f32
    %73 = vector.broadcast %cst_81 : f32 to vector<32x16xf32>
    %74 = arith.cmpf ogt, %72, %73 : vector<32x16xf32>
    %cst_82 = arith.constant 0.00999999977 : f32
    %75 = vector.broadcast %cst_82 : f32 to vector<32x16xf32>
    %76 = arith.mulf %75, %72 : vector<32x16xf32>
    %77 = arith.select %74, %72, %76 : vector<32x16xi1>, vector<32x16xf32>
    %c0_83 = arith.constant 0 : index
    %c0_84 = arith.constant 0 : index
    %78 = vector.load %arg1[%c0_83, %c0_84] : memref<16x5xf32, #tpu.memory_space<vmem>>, vector<16x5xf32>
    %cst_85 = arith.constant dense<0.000000e+00> : vector<16x16xf32>
    %79 = tpu.matmul %78, %2, %cst_85 {dimension_numbers = #tpu.dot_dimension_numbers<[1], [0], [0], [1], [0, 0, 1, 1], [], []>} : vector<16x5xf32>, vector<5x16xf32>, vector<16x16xf32> -> vector<16x16xf32>
    %80 = vector.broadcast %3 : vector<1x16xf32> to vector<16x16xf32>
    %81 = arith.addf %79, %80 : vector<16x16xf32>
    %cst_86 = arith.constant 0.000000e+00 : f32
    %82 = vector.broadcast %cst_86 : f32 to vector<16x16xf32>
    %83 = arith.cmpf ogt, %81, %82 : vector<16x16xf32>
    %cst_87 = arith.constant 0.00999999977 : f32
    %84 = vector.broadcast %cst_87 : f32 to vector<16x16xf32>
    %85 = arith.mulf %84, %81 : vector<16x16xf32>
    %86 = arith.select %83, %81, %85 : vector<16x16xi1>, vector<16x16xf32>
    %c0_88 = arith.constant 0 : index
    %c0_89 = arith.constant 0 : index
    %87 = vector.load %arg2[%c0_88, %c0_89] : memref<2x4xf32, #tpu.memory_space<vmem>>, vector<2x4xf32>
    %cst_90 = arith.constant dense<0.000000e+00> : vector<2x8xf32>
    %88 = tpu.matmul %87, %4, %cst_90 {dimension_numbers = #tpu.dot_dimension_numbers<[1], [0], [0], [1], [0, 0, 1, 1], [], []>} : vector<2x4xf32>, vector<4x8xf32>, vector<2x8xf32> -> vector<2x8xf32>
    %89 = vector.broadcast %5 : vector<1x8xf32> to vector<2x8xf32>
    %90 = arith.addf %88, %89 : vector<2x8xf32>
    %cst_91 = arith.constant 0.000000e+00 : f32
    %91 = vector.broadcast %cst_91 : f32 to vector<2x8xf32>
    %92 = arith.cmpf ogt, %90, %91 : vector<2x8xf32>
    %cst_92 = arith.constant 0.00999999977 : f32
    %93 = vector.broadcast %cst_92 : f32 to vector<2x8xf32>
    %94 = arith.mulf %93, %90 : vector<2x8xf32>
    %95 = arith.select %92, %90, %94 : vector<2x8xi1>, vector<2x8xf32>
    %c0_i32 = arith.constant 0 : i32
    %cst_93 = arith.constant dense<0.000000e+00> : vector<32x16xf32>
    %96 = tpu.matmul %32, %86, %cst_93 {dimension_numbers = #tpu.dot_dimension_numbers<[1], [0], [0], [1], [0, 0, 1, 1], [], []>} : vector<32x16xf32>, vector<16x16xf32>, vector<32x16xf32> -> vector<32x16xf32>
    %cst_94 = arith.constant dense<0.000000e+00> : vector<32x16xf32>
    %97 = tpu.matmul %38, %86, %cst_94 {dimension_numbers = #tpu.dot_dimension_numbers<[1], [0], [0], [1], [0, 0, 1, 1], [], []>} : vector<32x16xf32>, vector<16x16xf32>, vector<32x16xf32> -> vector<32x16xf32>
    %cst_95 = arith.constant dense<0.000000e+00> : vector<32x8xf32>
    %98 = tpu.matmul %52, %95, %cst_95 {dimension_numbers = #tpu.dot_dimension_numbers<[1], [0], [0], [1], [0, 0, 1, 1], [], []>} : vector<32x2xf32>, vector<2x8xf32>, vector<32x8xf32> -> vector<32x8xf32>
    %99 = tpu.concatenate %96, %97, %77, %98 in 1 : vector<32x16xf32>, vector<32x16xf32>, vector<32x16xf32>, vector<32x8xf32> -> vector<32x56xf32>
    %cst_96 = arith.constant dense<0.000000e+00> : vector<32x32xf32>
    %100 = tpu.matmul %99, %6, %cst_96 {dimension_numbers = #tpu.dot_dimension_numbers<[1], [0], [0], [1], [0, 0, 1, 1], [], []>} : vector<32x56xf32>, vector<56x32xf32>, vector<32x32xf32> -> vector<32x32xf32>
    %101 = vector.broadcast %7 : vector<1x32xf32> to vector<32x32xf32>
    %102 = arith.addf %100, %101 : vector<32x32xf32>
    %cst_97 = arith.constant 0.000000e+00 : f32
    %103 = vector.broadcast %cst_97 : f32 to vector<32x32xf32>
    %104 = arith.cmpf ogt, %102, %103 : vector<32x32xf32>
    %cst_98 = arith.constant 0.00999999977 : f32
    %105 = vector.broadcast %cst_98 : f32 to vector<32x32xf32>
    %106 = arith.mulf %105, %102 : vector<32x32xf32>
    %107 = arith.select %104, %102, %106 : vector<32x32xi1>, vector<32x32xf32>
    %cst_99 = arith.constant dense<0.000000e+00> : vector<32x16xf32>
    %108 = tpu.matmul %107, %8, %cst_99 {dimension_numbers = #tpu.dot_dimension_numbers<[1], [0], [0], [1], [0, 0, 1, 1], [], []>} : vector<32x32xf32>, vector<32x16xf32>, vector<32x16xf32> -> vector<32x16xf32>
    %109 = vector.broadcast %9 : vector<1x16xf32> to vector<32x16xf32>
    %110 = arith.addf %108, %109 : vector<32x16xf32>
    %111 = tpu.concatenate %96, %110 in 1 : vector<32x16xf32>, vector<32x16xf32> -> vector<32x32xf32>
    %cst_100 = arith.constant dense<0.000000e+00> : vector<32x32xf32>
    %112 = tpu.matmul %111, %10, %cst_100 {dimension_numbers = #tpu.dot_dimension_numbers<[1], [0], [0], [1], [0, 0, 1, 1], [], []>} : vector<32x32xf32>, vector<32x32xf32>, vector<32x32xf32> -> vector<32x32xf32>
    %113 = vector.broadcast %11 : vector<1x32xf32> to vector<32x32xf32>
    %114 = arith.addf %112, %113 : vector<32x32xf32>
    %cst_101 = arith.constant 0.000000e+00 : f32
    %115 = vector.broadcast %cst_101 : f32 to vector<32x32xf32>
    %116 = arith.cmpf ogt, %114, %115 : vector<32x32xf32>
    %cst_102 = arith.constant 0.00999999977 : f32
    %117 = vector.broadcast %cst_102 : f32 to vector<32x32xf32>
    %118 = arith.mulf %117, %114 : vector<32x32xf32>
    %119 = arith.select %116, %114, %118 : vector<32x32xi1>, vector<32x32xf32>
    %cst_103 = arith.constant dense<0.000000e+00> : vector<16x32xf32>
    %120 = tpu.matmul %45, %119, %cst_103 {dimension_numbers = #tpu.dot_dimension_numbers<[1], [0], [0], [1], [0, 0, 1, 1], [], []>} : vector<16x32xf32>, vector<32x32xf32>, vector<16x32xf32> -> vector<16x32xf32>
    %121 = vector.broadcast %67 : vector<16x1xf32> to vector<16x32xf32>
    %122 = arith.mulf %120, %121 : vector<16x32xf32>
    %cst_104 = arith.constant dense<0.000000e+00> : vector<16x8xf32>
    %123 = tpu.matmul %59, %95, %cst_104 {dimension_numbers = #tpu.dot_dimension_numbers<[1], [0], [0], [1], [0, 0, 1, 1], [], []>} : vector<16x2xf32>, vector<2x8xf32>, vector<16x8xf32> -> vector<16x8xf32>
    %124 = tpu.concatenate %86, %122, %123 in 1 : vector<16x16xf32>, vector<16x32xf32>, vector<16x8xf32> -> vector<16x56xf32>
    %cst_105 = arith.constant dense<0.000000e+00> : vector<16x32xf32>
    %125 = tpu.matmul %124, %12, %cst_105 {dimension_numbers = #tpu.dot_dimension_numbers<[1], [0], [0], [1], [0, 0, 1, 1], [], []>} : vector<16x56xf32>, vector<56x32xf32>, vector<16x32xf32> -> vector<16x32xf32>
    %126 = vector.broadcast %13 : vector<1x32xf32> to vector<16x32xf32>
    %127 = arith.addf %125, %126 : vector<16x32xf32>
    %cst_106 = arith.constant 0.000000e+00 : f32
    %128 = vector.broadcast %cst_106 : f32 to vector<16x32xf32>
    %129 = arith.cmpf ogt, %127, %128 : vector<16x32xf32>
    %cst_107 = arith.constant 0.00999999977 : f32
    %130 = vector.broadcast %cst_107 : f32 to vector<16x32xf32>
    %131 = arith.mulf %130, %127 : vector<16x32xf32>
    %132 = arith.select %129, %127, %131 : vector<16x32xi1>, vector<16x32xf32>
    %cst_108 = arith.constant dense<0.000000e+00> : vector<16x16xf32>
    %133 = tpu.matmul %132, %14, %cst_108 {dimension_numbers = #tpu.dot_dimension_numbers<[1], [0], [0], [1], [0, 0, 1, 1], [], []>} : vector<16x32xf32>, vector<32x16xf32>, vector<16x16xf32> -> vector<16x16xf32>
    %134 = vector.broadcast %15 : vector<1x16xf32> to vector<16x16xf32>
    %135 = arith.addf %133, %134 : vector<16x16xf32>
    %cst_109 = arith.constant dense<0.000000e+00> : vector<2x16xf32>
    %136 = tpu.matmul %66, %135, %cst_109 {dimension_numbers = #tpu.dot_dimension_numbers<[1], [0], [0], [1], [0, 0, 1, 1], [], []>} : vector<2x16xf32>, vector<16x16xf32>, vector<2x16xf32> -> vector<2x16xf32>
    %137 = vector.broadcast %68 : vector<2x1xf32> to vector<2x16xf32>
    %138 = arith.mulf %136, %137 : vector<2x16xf32>
    %139 = tpu.concatenate %95, %138 in 1 : vector<2x8xf32>, vector<2x16xf32> -> vector<2x24xf32>
    %cst_110 = arith.constant dense<0.000000e+00> : vector<2x32xf32>
    %140 = tpu.matmul %139, %16, %cst_110 {dimension_numbers = #tpu.dot_dimension_numbers<[1], [0], [0], [1], [0, 0, 1, 1], [], []>} : vector<2x24xf32>, vector<24x32xf32>, vector<2x32xf32> -> vector<2x32xf32>
    %141 = vector.broadcast %17 : vector<1x32xf32> to vector<2x32xf32>
    %142 = arith.addf %140, %141 : vector<2x32xf32>
    %cst_111 = arith.constant 0.000000e+00 : f32
    %143 = vector.broadcast %cst_111 : f32 to vector<2x32xf32>
    %144 = arith.cmpf ogt, %142, %143 : vector<2x32xf32>
    %cst_112 = arith.constant 0.00999999977 : f32
    %145 = vector.broadcast %cst_112 : f32 to vector<2x32xf32>
    %146 = arith.mulf %145, %142 : vector<2x32xf32>
    %147 = arith.select %144, %142, %146 : vector<2x32xi1>, vector<2x32xf32>
    %cst_113 = arith.constant dense<0.000000e+00> : vector<2x8xf32>
    %148 = tpu.matmul %147, %18, %cst_113 {dimension_numbers = #tpu.dot_dimension_numbers<[1], [0], [0], [1], [0, 0, 1, 1], [], []>} : vector<2x32xf32>, vector<32x8xf32>, vector<2x8xf32> -> vector<2x8xf32>
    %149 = vector.broadcast %19 : vector<1x8xf32> to vector<2x8xf32>
    %150 = arith.addf %148, %149 : vector<2x8xf32>
    %c1_i32 = arith.constant 1 : i32
    %cst_114 = arith.constant dense<0.000000e+00> : vector<32x16xf32>
    %151 = tpu.matmul %32, %135, %cst_114 {dimension_numbers = #tpu.dot_dimension_numbers<[1], [0], [0], [1], [0, 0, 1, 1], [], []>} : vector<32x16xf32>, vector<16x16xf32>, vector<32x16xf32> -> vector<32x16xf32>
    %cst_115 = arith.constant dense<0.000000e+00> : vector<32x16xf32>
    %152 = tpu.matmul %38, %135, %cst_115 {dimension_numbers = #tpu.dot_dimension_numbers<[1], [0], [0], [1], [0, 0, 1, 1], [], []>} : vector<32x16xf32>, vector<16x16xf32>, vector<32x16xf32> -> vector<32x16xf32>
    %cst_116 = arith.constant dense<0.000000e+00> : vector<32x8xf32>
    %153 = tpu.matmul %52, %150, %cst_116 {dimension_numbers = #tpu.dot_dimension_numbers<[1], [0], [0], [1], [0, 0, 1, 1], [], []>} : vector<32x2xf32>, vector<2x8xf32>, vector<32x8xf32> -> vector<32x8xf32>
    %154 = tpu.concatenate %151, %152, %110, %153 in 1 : vector<32x16xf32>, vector<32x16xf32>, vector<32x16xf32>, vector<32x8xf32> -> vector<32x56xf32>
    %cst_117 = arith.constant dense<0.000000e+00> : vector<32x32xf32>
    %155 = tpu.matmul %154, %6, %cst_117 {dimension_numbers = #tpu.dot_dimension_numbers<[1], [0], [0], [1], [0, 0, 1, 1], [], []>} : vector<32x56xf32>, vector<56x32xf32>, vector<32x32xf32> -> vector<32x32xf32>
    %156 = vector.broadcast %7 : vector<1x32xf32> to vector<32x32xf32>
    %157 = arith.addf %155, %156 : vector<32x32xf32>
    %cst_118 = arith.constant 0.000000e+00 : f32
    %158 = vector.broadcast %cst_118 : f32 to vector<32x32xf32>
    %159 = arith.cmpf ogt, %157, %158 : vector<32x32xf32>
    %cst_119 = arith.constant 0.00999999977 : f32
    %160 = vector.broadcast %cst_119 : f32 to vector<32x32xf32>
    %161 = arith.mulf %160, %157 : vector<32x32xf32>
    %162 = arith.select %159, %157, %161 : vector<32x32xi1>, vector<32x32xf32>
    %cst_120 = arith.constant dense<0.000000e+00> : vector<32x16xf32>
    %163 = tpu.matmul %162, %8, %cst_120 {dimension_numbers = #tpu.dot_dimension_numbers<[1], [0], [0], [1], [0, 0, 1, 1], [], []>} : vector<32x32xf32>, vector<32x16xf32>, vector<32x16xf32> -> vector<32x16xf32>
    %164 = vector.broadcast %9 : vector<1x16xf32> to vector<32x16xf32>
    %165 = arith.addf %163, %164 : vector<32x16xf32>
    %166 = tpu.concatenate %151, %165 in 1 : vector<32x16xf32>, vector<32x16xf32> -> vector<32x32xf32>
    %cst_121 = arith.constant dense<0.000000e+00> : vector<32x32xf32>
    %167 = tpu.matmul %166, %10, %cst_121 {dimension_numbers = #tpu.dot_dimension_numbers<[1], [0], [0], [1], [0, 0, 1, 1], [], []>} : vector<32x32xf32>, vector<32x32xf32>, vector<32x32xf32> -> vector<32x32xf32>
    %168 = vector.broadcast %11 : vector<1x32xf32> to vector<32x32xf32>
    %169 = arith.addf %167, %168 : vector<32x32xf32>
    %cst_122 = arith.constant 0.000000e+00 : f32
    %170 = vector.broadcast %cst_122 : f32 to vector<32x32xf32>
    %171 = arith.cmpf ogt, %169, %170 : vector<32x32xf32>
    %cst_123 = arith.constant 0.00999999977 : f32
    %172 = vector.broadcast %cst_123 : f32 to vector<32x32xf32>
    %173 = arith.mulf %172, %169 : vector<32x32xf32>
    %174 = arith.select %171, %169, %173 : vector<32x32xi1>, vector<32x32xf32>
    %cst_124 = arith.constant dense<0.000000e+00> : vector<16x32xf32>
    %175 = tpu.matmul %45, %174, %cst_124 {dimension_numbers = #tpu.dot_dimension_numbers<[1], [0], [0], [1], [0, 0, 1, 1], [], []>} : vector<16x32xf32>, vector<32x32xf32>, vector<16x32xf32> -> vector<16x32xf32>
    %176 = vector.broadcast %67 : vector<16x1xf32> to vector<16x32xf32>
    %177 = arith.mulf %175, %176 : vector<16x32xf32>
    %cst_125 = arith.constant dense<0.000000e+00> : vector<16x8xf32>
    %178 = tpu.matmul %59, %150, %cst_125 {dimension_numbers = #tpu.dot_dimension_numbers<[1], [0], [0], [1], [0, 0, 1, 1], [], []>} : vector<16x2xf32>, vector<2x8xf32>, vector<16x8xf32> -> vector<16x8xf32>
    %179 = tpu.concatenate %135, %177, %178 in 1 : vector<16x16xf32>, vector<16x32xf32>, vector<16x8xf32> -> vector<16x56xf32>
    %cst_126 = arith.constant dense<0.000000e+00> : vector<16x32xf32>
    %180 = tpu.matmul %179, %12, %cst_126 {dimension_numbers = #tpu.dot_dimension_numbers<[1], [0], [0], [1], [0, 0, 1, 1], [], []>} : vector<16x56xf32>, vector<56x32xf32>, vector<16x32xf32> -> vector<16x32xf32>
    %181 = vector.broadcast %13 : vector<1x32xf32> to vector<16x32xf32>
    %182 = arith.addf %180, %181 : vector<16x32xf32>
    %cst_127 = arith.constant 0.000000e+00 : f32
    %183 = vector.broadcast %cst_127 : f32 to vector<16x32xf32>
    %184 = arith.cmpf ogt, %182, %183 : vector<16x32xf32>
    %cst_128 = arith.constant 0.00999999977 : f32
    %185 = vector.broadcast %cst_128 : f32 to vector<16x32xf32>
    %186 = arith.mulf %185, %182 : vector<16x32xf32>
    %187 = arith.select %184, %182, %186 : vector<16x32xi1>, vector<16x32xf32>
    %cst_129 = arith.constant dense<0.000000e+00> : vector<16x16xf32>
    %188 = tpu.matmul %187, %14, %cst_129 {dimension_numbers = #tpu.dot_dimension_numbers<[1], [0], [0], [1], [0, 0, 1, 1], [], []>} : vector<16x32xf32>, vector<32x16xf32>, vector<16x16xf32> -> vector<16x16xf32>
    %189 = vector.broadcast %15 : vector<1x16xf32> to vector<16x16xf32>
    %190 = arith.addf %188, %189 : vector<16x16xf32>
    %cst_130 = arith.constant dense<0.000000e+00> : vector<2x16xf32>
    %191 = tpu.matmul %66, %190, %cst_130 {dimension_numbers = #tpu.dot_dimension_numbers<[1], [0], [0], [1], [0, 0, 1, 1], [], []>} : vector<2x16xf32>, vector<16x16xf32>, vector<2x16xf32> -> vector<2x16xf32>
    %192 = vector.broadcast %68 : vector<2x1xf32> to vector<2x16xf32>
    %193 = arith.mulf %191, %192 : vector<2x16xf32>
    %194 = tpu.concatenate %150, %193 in 1 : vector<2x8xf32>, vector<2x16xf32> -> vector<2x24xf32>
    %cst_131 = arith.constant dense<0.000000e+00> : vector<2x32xf32>
    %195 = tpu.matmul %194, %16, %cst_131 {dimension_numbers = #tpu.dot_dimension_numbers<[1], [0], [0], [1], [0, 0, 1, 1], [], []>} : vector<2x24xf32>, vector<24x32xf32>, vector<2x32xf32> -> vector<2x32xf32>
    %196 = vector.broadcast %17 : vector<1x32xf32> to vector<2x32xf32>
    %197 = arith.addf %195, %196 : vector<2x32xf32>
    %cst_132 = arith.constant 0.000000e+00 : f32
    %198 = vector.broadcast %cst_132 : f32 to vector<2x32xf32>
    %199 = arith.cmpf ogt, %197, %198 : vector<2x32xf32>
    %cst_133 = arith.constant 0.00999999977 : f32
    %200 = vector.broadcast %cst_133 : f32 to vector<2x32xf32>
    %201 = arith.mulf %200, %197 : vector<2x32xf32>
    %202 = arith.select %199, %197, %201 : vector<2x32xi1>, vector<2x32xf32>
    %cst_134 = arith.constant dense<0.000000e+00> : vector<2x8xf32>
    %203 = tpu.matmul %202, %18, %cst_134 {dimension_numbers = #tpu.dot_dimension_numbers<[1], [0], [0], [1], [0, 0, 1, 1], [], []>} : vector<2x32xf32>, vector<32x8xf32>, vector<2x8xf32> -> vector<2x8xf32>
    %204 = vector.broadcast %19 : vector<1x8xf32> to vector<2x8xf32>
    %205 = arith.addf %203, %204 : vector<2x8xf32>
    %206 = tpu.transpose %165, [1, 0] : vector<32x16xf32> -> vector<16x32xf32>
    %cst_135 = arith.constant dense<0.000000e+00> : vector<1x32xf32>
    %207 = tpu.matmul %20, %206, %cst_135 {dimension_numbers = #tpu.dot_dimension_numbers<[1], [0], [0], [1], [0, 0, 1, 1], [], []>} : vector<1x16xf32>, vector<16x32xf32>, vector<1x32xf32> -> vector<1x32xf32>
    %208 = vector.broadcast %21 : vector<1x1xf32> to vector<1x32xf32>
    %209 = arith.addf %207, %208 : vector<1x32xf32>
    %c0_136 = arith.constant 0 : index
    %c0_137 = arith.constant 0 : index
    %210 = vector.load %arg37[%c0_136, %c0_137] : memref<1x32xf32, #tpu.memory_space<vmem>>, vector<1x32xf32>
    tpu.vector_store %arg37[%c0_136, %c0_137], %209 {strides = array<i32>} : memref<1x32xf32, #tpu.memory_space<vmem>>, vector<1x32xf32>,
    %cst_138 = arith.constant dense<0.000000e+00> : vector<2x16xf32>
    %211 = tpu.matmul %205, %22, %cst_138 {dimension_numbers = #tpu.dot_dimension_numbers<[1], [0], [0], [1], [0, 0, 1, 1], [], []>} : vector<2x8xf32>, vector<8x16xf32>, vector<2x16xf32> -> vector<2x16xf32>
    %212 = vector.broadcast %23 : vector<1x16xf32> to vector<2x16xf32>
    %213 = arith.addf %211, %212 : vector<2x16xf32>
    %cst_139 = arith.constant 0.000000e+00 : f32
    %214 = vector.broadcast %cst_139 : f32 to vector<2x16xf32>
    %215 = arith.cmpf ogt, %213, %214 : vector<2x16xf32>
    %cst_140 = arith.constant 0.00999999977 : f32
    %216 = vector.broadcast %cst_140 : f32 to vector<2x16xf32>
    %217 = arith.mulf %216, %213 : vector<2x16xf32>
    %218 = arith.select %215, %213, %217 : vector<2x16xi1>, vector<2x16xf32>
    %219 = tpu.transpose %218, [1, 0] : vector<2x16xf32> -> vector<16x2xf32>
    %cst_141 = arith.constant dense<0.000000e+00> : vector<1x2xf32>
    %220 = tpu.matmul %24, %219, %cst_141 {dimension_numbers = #tpu.dot_dimension_numbers<[1], [0], [0], [1], [0, 0, 1, 1], [], []>} : vector<1x16xf32>, vector<16x2xf32>, vector<1x2xf32> -> vector<1x2xf32>
    %221 = vector.broadcast %25 : vector<1x1xf32> to vector<1x2xf32>
    %222 = arith.addf %220, %221 : vector<1x2xf32>
    %c0_142 = arith.constant 0 : index
    %c0_143 = arith.constant 0 : index
    %223 = vector.load %arg38[%c0_142, %c0_143] : memref<1x2xf32, #tpu.memory_space<vmem>>, vector<1x2xf32>
    tpu.vector_store %arg38[%c0_142, %c0_143], %222 {strides = array<i32>} : memref<1x2xf32, #tpu.memory_space<vmem>>, vector<1x2xf32>,
    return
  }
}

</mosaic_0001>

<bundles_post_ra>
// kernel: tpu_custom_call.1
= control target key start
LH: loop header
LB: loop body
LE: loop exit
PB: predicated region body
PF: predicated region fallthrough
CT: control target
= control target key end

     0   :  { %s4385_s6 = smov 1   ;;  %s4386_s10 = smov 2   ;;  %s5287_s0 = inlined_call_operand.smem [shape: u32[39], index: -1, kind: input, shape index: {}] }
   0x1   :  { %s4441_s5 = sld [smem:[%s5287_s0]]   ;;  %s4387_s14 = smov 3  }
   0x2   :  { %s4446_s9 = sld [smem:[%s5287_s0 + %s4385_s6]]   ;;  %s4388_s18 = smov 4  }
   0x3   :  { %s4451_s13 = sld [smem:[%s5287_s0 + %s4386_s10]]   ;;  %s4389_s22 = smov 5  }
   0x4   :  { %s4456_s17 = sld [smem:[%s5287_s0 + %s4387_s14]]   ;;  %s4390_s26 = smov 6  }
   0x5   :  { %s4461_s21 = sld [smem:[%s5287_s0 + %s4388_s18]]   ;;  %s4391_s30 = smov 7  }
   0x6   :  { %s4466_s25 = sld [smem:[%s5287_s0 + %s4389_s22]]   ;;  %s4392_s4 = smov 8  }
   0x7   :  { %s4471_s29 = sld [smem:[%s5287_s0 + %s4390_s26]]   ;;  %s4393_s10 = smov 9  }
   0x8   :  { %s4476_s3 = sld [smem:[%s5287_s0 + %s4391_s30]]   ;;  %s4394_s15 = smov 10  }
   0x9   :  { %s4481_s8 = sld [smem:[%s5287_s0 + %s4392_s4]]   ;;  %s4395_s20 = smov 11  }
   0xa   :  { %s4486_s14 = sld [smem:[%s5287_s0 + %s4393_s10]]   ;;  %s4396_s26 = smov 12  }
   0xb   :  { %s4491_s19 = sld [smem:[%s5287_s0 + %s4394_s15]]   ;;  %s4397_s1 = smov 13  }
   0xc   :  { %5296 = sst [smem:[#allocation10_spill]] %s4466_s25  ;;  %s4398_s7 = smov 14  }
   0xd   :  { %s4496_s24 = sld [smem:[%s5287_s0 + %s4395_s20]]   ;;  %s4399_s15 = smov 15  }
   0xe   :  { %5297 = sst [smem:[#allocation11_spill]] %s4476_s3  ;;  %s4400_s22 = smov 16  }
   0xf   :  { %5298 = sst [smem:[#allocation12_spill]] %s4481_s8  ;;  %s4401_s28 = smov 17  }
  0x10   :  { %5299 = sst [smem:[#allocation13_spill]] %s4486_s14  ;;  %s4418_s10 = smov 34  }
  0x11   :  { %5300 = sst [smem:[#allocation14_spill]] %s4491_s19  ;;  %s4419_s16 = smov 35  }
  0x12   :  { %s4501_s30 = sld [smem:[%s5287_s0 + %s4396_s26]]   ;;  %s4420_s23 = smov 37  }
  0x13   :  { %s4506_s6 = sld [smem:[%s5287_s0 + %s4397_s1]]   ;;  %s4417_s1 = smov 33  }
  0x14   :  { %s4511_s12 = sld [smem:[%s5287_s0 + %s4398_s7]]   ;;  %s4402_s7 = smov 18  }
  0x15   :  { %s4516_s20 = sld [smem:[%s5287_s0 + %s4399_s15]]   ;;  %s4403_s15 = smov 19  }
  0x16   :  { %s4521_s27 = sld [smem:[%s5287_s0 + %s4400_s22]]   ;;  %s4404_s22 = smov 20  }
  0x17   :  { %s4526_s4 = sld [smem:[%s5287_s0 + %s4401_s28]]   ;;  %s4405_s28 = smov 21  }
  0x18   :  { %s4531_s8 = sld [smem:[%s5287_s0 + %s4402_s7]]   ;;  %s4406_s7 = smov 22  }
  0x19   :  { %s4536_s19 = sld [smem:[%s5287_s0 + %s4403_s15]]   ;;  %s4407_s15 = smov 23  }
  0x1a   :  { %s4541_s25 = sld [smem:[%s5287_s0 + %s4404_s22]]   ;;  %s4408_s22 = smov 24  }
  0x1b   :  { %s4546_s14 = sld [smem:[%s5287_s0 + %s4405_s28]]   ;;  %s4409_s28 = smov 25  }
  0x1c   :  { %s4551_s3 = sld [smem:[%s5287_s0 + %s4406_s7]]   ;;  %s4410_s7 = smov 26  }
  0x1e   :  { %5301 = sst [smem:[#allocation15_spill]] %s4531_s8 }
  0x1f   :  { %5302 = sst [smem:[#allocation16_spill]] %s4536_s19 }
  0x20   :  { %5303 = sst [smem:[#allocation17_spill]] %s4541_s25 }
  0x21   :  { %5304 = sst [smem:[#allocation18_spill]] %s4546_s14 }
  0x22   :  { %5305 = sst [smem:[#allocation19_spill]] %s4551_s3 }
  0x23   :  { %s4556_s8 = sld [smem:[%s5287_s0 + %s4407_s15]]   ;;  %s4411_s15 = smov 27  }
  0x24   :  { %s4561_s25 = sld [smem:[%s5287_s0 + %s4408_s22]]   ;;  %s4412_s22 = smov 28  }
  0x25   :  { %s4566_s14 = sld [smem:[%s5287_s0 + %s4409_s28]]   ;;  %s4413_s28 = smov 29  }
  0x26   :  { %s4571_s3 = sld [smem:[%s5287_s0 + %s4410_s7]]   ;;  %s4414_s7 = smov 30  }
  0x27   :  { %s4619_s19 = sld [smem:[%s5287_s0 + %s4420_s23]]  }
  0x29   :  { %5306 = sst [smem:[#allocation20_spill]] %s4556_s8 }
  0x2a   :  { %5307 = sst [smem:[#allocation21_spill]] %s4561_s25 }
  0x2b   :  { %5308 = sst [smem:[#allocation22_spill]] %s4566_s14 }
  0x2c   :  { %5309 = sst [smem:[#allocation23_spill]] %s4571_s3 }
  0x2d   :  { %s4576_s8 = sld [smem:[%s5287_s0 + %s4411_s15]]   ;;  %s4415_s15 = smov 31  }
  0x2e   :  { %s4581_s25 = sld [smem:[%s5287_s0 + %s4412_s22]]   ;;  %s4416_s22 = smov 32  }
  0x2f   :  { %s4586_s14 = sld [smem:[%s5287_s0 + %s4413_s28]]  }
  0x30   :  { %s4591_s3 = sld [smem:[%s5287_s0 + %s4414_s7]]  }
  0x33   :  { %5310 = sst [smem:[#allocation24_spill]] %s4576_s8 }
  0x34   :  { %5311 = sst [smem:[#allocation25_spill]] %s4581_s25 }
  0x35   :  { %5312 = sst [smem:[#allocation26_spill]] %s4586_s14 }
  0x36   :  { %5313 = sst [smem:[#allocation27_spill]] %s4591_s3 }
  0x37   :  { %s4596_s8 = sld [smem:[%s5287_s0 + %s4415_s15]]  }
  0x38   :  { %s3503_s25 = sld [smem:[%s5287_s0 + %s4416_s22]]  }
  0x39   :  { %s4604_s14 = sld [smem:[%s5287_s0 + %s4417_s1]]   ;;  %s4421_s1 = smov 38  }
  0x3a   :  { %s4609_s3 = sld [smem:[%s5287_s0 + %s4418_s10]]   ;;  %s4422_s10 = smov 36  }
  0x3b   :  { %s3507_s15 = sld [smem:[%s5287_s0 + %s4422_s10]]  }
  0x3d   :  { %5314 = sst [smem:[#allocation28_spill]] %s4596_s8 }
  0x3e   :  { %s4614_s8 = sld [smem:[%s5287_s0 + %s4419_s16]]   ;;  %v83_v0 = vstv %s3503_s25 }
  0x3f   :  { %5315 = sst [smem:[#allocation29_spill]] %s4604_s14  ;;  %84 = vst [vmem:[#allocation2] sm:$0x1] %v83_v0 }
  0x40   :  { %s4624_s14 = sld [smem:[%s5287_s0 + %s4421_s1]]  }
  0x41   :  { %v85_v1 = vstv %s3507_s15 }
  0x42   :  { %86 = vst [vmem:[#allocation3] sm:$0x1] %v85_v1 }
  0x43   :  { %87 = vsyncpa [#allocation5], 0  ;;  %v165_v2 = vld [vmem:[%s4506_s6] sm:$0x1f]  ;;  %vm462_vm0 = vcmask 1044480   ;;  %vm455_vm1 = vcmask 39936  }
  0x44   :  { %v447_v3 = vld [vmem:[%s4446_s9] sm:$0xff]  ;;  %v448_v4 = vld [vmem:[%s4446_s9 + $0x8] sm:$0xff]  ;;  %3802 = vmatprep.subr.msk.mxu1 %vm462_vm0, %v165_v2  ;;  %vm558_vm2 = vcmask 1043456   ;;  %v4423_v6 = vmov 0.0   ;;  %v219_v8 = vld [vmem:[%s4456_s17 + $0x10] sm:$0xff]  ;;  %vm4424_vm3 = vmmov 0  }
  0x45   :  { %3804 = vmatprep.mubr.msk.f32.mxu1 %vm455_vm1, %v447_v3  ;;  %v167_v5 = vld [vmem:[%s4516_s20] sm:$0xf]  ;;  %3803 = vmatpush3.msk.msra.mxu1 %vm462_vm0, %v165_v2  ;;  %vm554_vm4 = vcmask 31744   ;;  %v4425_v10 = vmov 0  }
  0x46   :  { %3805 = vmatmul.mubr.msk.f32.vlgmr.msra.gmra.mrb[0].mxu1 %vm455_vm1, %v448_v4  ;;  %3807 = vmatprep.subr.mxu1 %v4423_v6  ;;  %v217_v7 = vld [vmem:[%s4456_s17] sm:$0xff] }
  0x47   :  { %3808 = vmatpush3.msk.msra.mxu1 %vm558_vm2, %v167_v5  ;;  %3809 = vmatprep.mubr.msk.f32.mxu1 %vm4424_vm3, %v4423_v6  ;;  %v547_v9 = vld [vmem:[%s4451_s13] sm:$0x3] }
  0x48   :  { %4335 = vset.pattern.permute.xlu0 %v4425_v10  ;;  %4336 = vset.pattern.permute.xlu1 %v4425_v10 }
  0x49   :  { %222 = vperm.xlu0 %4335, %v217_v7   ;;  %228 = vperm.xlu1 %4336, %v219_v8  }
  0x4a   :  { %88 = vsyncpa [#allocation7], 0  ;;  %3810 = vmatmul.mubr.msk.f32.vlgmr.msra.gmra.mrb[2].mxu1 %vm554_vm4, %v547_v9  ;;  %v218_v11 = vld [vmem:[%s4456_s17 + $0x8] sm:$0xff]  ;;  %v220_v12 = vld [vmem:[%s4456_s17 + $0x18] sm:$0xff]  ;;  %vm346_vm5 = vcmask 1045504   ;;  %vm333_vm6 = vcmask 48128   ;;  %v215_v26 = vlaneseq }
  0x4b   :  { %v241_v13 = vld [vmem:[%s4461_s21] sm:$0xff]  ;;  %v242_v14 = vld [vmem:[%s4461_s21 + $0x8] sm:$0xff]  ;;  %v243_v17 = vld [vmem:[%s4461_s21 + $0x10] sm:$0xff]  ;;  %vm635_vm7 = vcmask 130048   ;;  %vm843_vm13 = vcmask 1041408   ;;  %s4426_s0 = smov 32  }
  0x4c   :  { %v277_v15 = vld [vmem:[%s4471_s29] sm:$0xff]  ;;  %v278_v16 = vld [vmem:[%s4471_s29 + $0x8] sm:$0xff]  ;;  %v244_v18 = vld [vmem:[%s4461_s21 + $0x18] sm:$0xff]  ;;  %v4655_v27 = vand.u32 127, %v215_v26  ;;  %s4428_s9 = smov 48   ;;  %s5316_s13 = sld [smem:[#allocation16_spill]] }
  0x4d   :  { %225 = vperm.xlu0 %4335, %v218_v11   ;;  %231 = vperm.xlu1 %4336, %v220_v12   ;;  %v279_v19 = vld [vmem:[%s4471_s29 + $0x10] sm:$0xff]  ;;  %v280_v20 = vld [vmem:[%s4471_s29 + $0x18] sm:$0xff]  ;;  %v163_v21 = vld [vmem:[%s4496_s24] sm:$0x3f]  ;;  %s5317_s17 = sld [smem:[#allocation15_spill]]  ;;  %s5318_s21 = sld [smem:[#allocation18_spill]] }
  0x4e   :  { %v323_v22 = vld [vmem:[%s4441_s5] sm:$0xff]  ;;  %3794 = vmatprep.subr.msk.mxu0 %vm346_vm5, %v163_v21  ;;  %v324_v23 = vld [vmem:[%s4441_s5 + $0x8] sm:$0xff]  ;;  %v325_v24 = vld [vmem:[%s4441_s5 + $0x10] sm:$0xff]  ;;  %s5319_s25 = sld [smem:[#allocation17_spill]]  ;;  %s5320_s29 = sld [smem:[#allocation11_spill]] }
  0x4f   :  { %3796 = vmatprep.mubr.msk.f32.mxu0 %vm333_vm6, %v323_v22  ;;  %3795 = vmatpush3.msk.msra.mxu0 %vm346_vm5, %v163_v21  ;;  %v326_v25 = vld [vmem:[%s4441_s5 + $0x18] sm:$0xff]  ;;  %v3518_v35 = vld [vmem:[%s4511_s12] ss:$0 sm:$0xff]  ;;  %s4427_s5 = smov 16   ;;  %s5321_s24 = sld [smem:[#allocation13_spill]] }
  0x50   :  { %3797 = vmatmul.mubr.msk.f32.vlgmr.msra.gmra.mrb[0].mxu0 %vm333_vm6, %v324_v23  ;;  %v3522_v41 = vld [vmem:[%s4521_s27] ss:$0 sm:$0xff]  ;;  %v170_v23 = vld [vmem:[%s4526_s4 + $0x8] sm:$0xff]  ;;  %s5323_s6 = sld [smem:[#allocation19_spill]]  ;;  %s5324_s12 = sld [smem:[#allocation20_spill]] }
  0x51   :  { %246 = vperm.xlu0 %4335, %v241_v13   ;;  %249 = vperm.xlu1 %4336, %v242_v14   ;;  %v3512_v3 = vld [vmem:[%s4501_s30] ss:$0 sm:$0xff]  ;;  %s5322_s30 = sld [smem:[#allocation10_spill]]  ;;  %s5325_s20 = sld [smem:[#allocation14_spill]] }
  0x52   :  { %3799 = vmatprep.mubr.msk.f32.mxu0 %vm333_vm6, %v325_v24  ;;  %v169_v22 = vld [vmem:[%s4526_s4] sm:$0xff]  ;;  %s5326_s27 = sld [smem:[#allocation22_spill]]  ;;  %s5328_s16 = sld [smem:[#allocation24_spill]] }
  0x53   :  { %v4750_v24 = vpack.c.bf16 %v170_v23, %v169_v22  ;;  %v177_v22 = vld [vmem:[%s5316_s13] sm:$0xff]  ;;  %v178_v23 = vld [vmem:[%s5316_s13 + $0x8] sm:$0xff]  ;;  %s5329_s18 = sld [smem:[#allocation23_spill]]  ;;  %s5330_s23 = sld [smem:[#allocation12_spill]] }
  0x54   :  { %3800 = vmatmul.mubr.msk.f32.gmra.mrb[2].mxu0 %vm333_vm6, %v326_v25  ;;  %vm830_vm6 = vcmask 15360   ;;  %v171_v25 = vld [vmem:[%s4526_s4 + $0x10] sm:$0xff]  ;;  %s5331_s22 = sld [smem:[#allocation26_spill]]  ;;  %s5332_s26 = sld [smem:[#allocation25_spill]] }
  0x55   :  { %282 = vperm.xlu0 %4335, %v277_v15   ;;  %285 = vperm.xlu1 %4336, %v278_v16   ;;  %s4430_s1 = smov 8   ;;  %s5333_s28 = sld [smem:[#allocation27_spill]] }
  0x56   :  { %s5334_s2 = sld [smem:[#allocation28_spill]]  ;;  %s5335_s10 = sld [smem:[#allocation29_spill]] }
  0x57   :  { %s4431_s7 = smov [#allocation4]  }
  0x58   :  { %s3450_s11 = sshll.u32 %s4431_s7, 4  ;;  %s3451_s11 = int_to_ptr.vmem [resolvable:$true] %s3450_s11 }
  0x59   :  { %252 = vperm.xlu0 %4335, %v243_v17   ;;  %255 = vperm.xlu1 %4336, %v244_v18   ;;  %s4337_s15 = scalar_lea.vmem %s3451_s11, 16  ;;  %p4342_p1 = scmp.lt.s32.totalorder %s3451_s11, %s3451_s11 }
  0x5a   :  { %p4338_p0 = scmp.ne.s32.totalorder %s3451_s11, %s4337_s15 }
  0x5d   :  { %288 = vperm.xlu0 %4335, %v279_v19   ;;  %291 = vperm.xlu1 %4336, %v280_v20  }
  0xc8   :  { %v223_v28 = vpop.permute.xlu0 %222  ;;  %v229_v33 = vpop.permute.xlu1 %228 }
  0xc9   :  { %vm233_vm8 = vcmp.eq.s32.totalorder %v4655_v27, %v223_v28  ;;  %vm235_vm0 = vcmp.eq.s32.totalorder %v4655_v27, %v229_v33  ;;  %v172_v28 = vld [vmem:[%s4526_s4 + $0x18] sm:$0xff]  ;;  %v174_v33 = vld [vmem:[%s4526_s4 + $0x28] sm:$0xff] }
  0xca   :  { %v4659_v29 = vsel %vm233_vm8, 1.0, %v4423_v6  ;;  %v4692_v58 = vsel %vm235_vm0, 1.0, %v4423_v6  ;;  %vm984_vm0 = vcmask 261120  }
  0xcb   :  { %3816 = vmatprep.mubr.msk.f32.mxu0 %vm635_vm7, %v4659_v29 }
  0xcc   :  { %v226_v30 = vpop.permute.xlu0 %225  ;;  %v232_v34 = vpop.permute.xlu1 %231 }
  0xcd   :  { %vm234_vm14 = vcmp.eq.s32.totalorder %v4655_v27, %v226_v30  ;;  %vm236_vm2 = vcmp.eq.s32.totalorder %v4655_v27, %v232_v34  ;;  %v4756_v30 = vpack.c.bf16 %v172_v28, %v171_v25  ;;  %v4809_v25 = vpack.c.bf16 %v178_v23, %v177_v22  ;;  %v179_v28 = vld [vmem:[%s5316_s13 + $0x10] sm:$0xff]  ;;  %v302_v22 = vld [vmem:[%s5320_s29 + $0x8] sm:$0xff]  ;;  %v301_v23 = vld [vmem:[%s5320_s29] sm:$0xff] }
  0xce   :  { %v4686_v55 = vsel %vm234_vm14, 1.0, %v4423_v6  ;;  %v4711_v61 = vsel %vm236_vm2, 1.0, %v4423_v6  ;;  %vm1000_vm2 = vcmask 457728  }
  0xd0   :  { %v247_v31 = vpop.permute.xlu0 %246  ;;  %v250_v36 = vpop.permute.xlu1 %249 }
  0xd1   :  { %vm257_vm9 = vcmp.eq.s32.totalorder %v4655_v27, %v247_v31  ;;  %vm258_vm15 = vcmp.eq.s32.totalorder %v4655_v27, %v250_v36  ;;  %v173_v31 = vld [vmem:[%s4526_s4 + $0x20] sm:$0xff] }
  0xd2   :  { %v4665_v32 = vsel %vm257_vm9, 1.0, %v4423_v6  ;;  %v4689_v56 = vsel %vm258_vm15, 1.0, %v4423_v6  ;;  %v4762_v34 = vpack.c.bf16 %v174_v33, %v173_v31  ;;  %v180_v31 = vld [vmem:[%s5316_s13 + $0x18] sm:$0xff] }
  0xd3   :  { %3826 = vmatprep.mubr.msk.f32.mxu1 %vm635_vm7, %v4665_v32  ;;  %v4815_v33 = vpack.c.bf16 %v180_v31, %v179_v28  ;;  %v321_v28 = vld [vmem:[%s5321_s24 + $0x8] sm:$0xff]  ;;  %v320_v31 = vld [vmem:[%s5321_s24] sm:$0xff] }
  0xd4   :  { %v283_v42 = vpop.permute.xlu0 %282  ;;  %v286_v49 = vpop.permute.xlu1 %285 }
  0xd5   :  { %vm293_vm5 = vcmp.eq.s32.totalorder %v4655_v27, %v283_v42  ;;  %vm294_vm8 = vcmp.eq.s32.totalorder %v4655_v27, %v286_v49 }
  0xd6   :  { %v4717_v63 = vsel %vm293_vm5, 1.0, %v4423_v6  ;;  %v4728_v1 = vsel %vm294_vm8, 1.0, %v4423_v6 }
  0xd8   :  { %v253_v53 = vpop.permute.xlu0 %252  ;;  %v256_v57 = vpop.permute.xlu1 %255 }
  0xd9   :  { %vm259_vm1 = vcmp.eq.s32.totalorder %v4655_v27, %v253_v53  ;;  %vm260_vm4 = vcmp.eq.s32.totalorder %v4655_v27, %v256_v57 }
  0xda   :  { %v4696_v59 = vsel %vm259_vm1, 1.0, %v4423_v6  ;;  %v4714_v62 = vsel %vm260_vm4, 1.0, %v4423_v6  ;;  %vm989_vm1 = vcmask 392192  }
  0xdc   :  { %v289_v60 = vpop.permute.xlu0 %288  ;;  %v292_v0 = vpop.permute.xlu1 %291 }
  0xdd   :  { %vm295_vm9 = vcmp.eq.s32.totalorder %v4655_v27, %v289_v60 }
  0xde   :  { %v4731_v2 = vsel %vm295_vm9, 1.0, %v4423_v6 }
 0x119   :  { %v3806_v37 = vpop.f32.mrb[0].mxu1 }
 0x11a   :  { %v538_v38 = vadd.f32 %v3806_v37, %v3518_v35  ;;  %v532_v39 = vpop.f32.mrb[1].mxu1 }
 0x11b   :  { %v533_v40 = vadd.f32 %v3518_v35, %v532_v39  ;;  %v4767_v35 = vld [vmem:[%s4526_s4 + $0x30] sm:$0xff]  ;;  %s5327_s4 = sld [smem:[#allocation21_spill]] }
 0x11c   :  { %vm542_vm10 = vcmp.gt.f32.partialorder %v538_v38, 0.0  ;;  %v544_v43 = vmul.f32 0.01, %v538_v38 }
 0x11d   :  { %vm541_vm11 = vcmp.gt.f32.partialorder %v533_v40, 0.0  ;;  %v543_v44 = vmul.f32 0.01, %v533_v40  ;;  %v628_v45 = vpop.f32.mrb[2].mxu1 }
 0x11e   :  { %v4671_v46 = vsel %vm542_vm10, %v538_v38, %v544_v43  ;;  %v629_v47 = vadd.f32 %v3522_v41, %v628_v45  ;;  %v3811_v48 = vpop.f32.mrb[3].mxu1  ;;  %vm296_vm10 = vcmp.eq.s32.totalorder %v4655_v27, %v292_v0 }
 0x11f   :  { %v4673_v50 = vsel %vm541_vm11, %v533_v40, %v543_v44  ;;  %v4740_v4 = vsel %vm296_vm10, 1.0, %v4423_v6 }
 0x120   :  { %v4127_v51 = vpack.c.bf16 %v4671_v46, %v4673_v50  ;;  %vm632_vm12 = vcmp.gt.f32.partialorder %v629_v47, 0.0  ;;  %v633_v52 = vmul.f32 0.01, %v629_v47 }
 0x122   :  { %4128 = vmatprep.subr.bf16.mxu0 %v4127_v51  ;;  %4132 = vmatprep.subr.bf16.mxu1 %v4127_v51  ;;  %v4679_v54 = vsel %vm632_vm12, %v629_v47, %v633_v52 }
 0x123   :  { %4130 = vmatpush3.bf16.msra.mxu0 %v4127_v51  ;;  %4134 = vmatpush3.bf16.msra.mxu1 %v4127_v51  ;;  %v3798_v5 = vpop.f32.mrb[0].mxu0 }
 0x124   :  { %3832 = vmatprep.subr.msk.mxu0 %vm843_vm13, %v4679_v54  ;;  %v422_v7 = vadd.f32 %v3798_v5, %v3512_v3  ;;  %v416_v8 = vpop.f32.mrb[1].mxu0  ;;  %4136 = vmatprep.subr.bf16.mxu1 %v4750_v24 }
 0x125   :  { %v417_v9 = vadd.f32 %v3512_v3, %v416_v8 }
 0x126   :  { %3817 = vmatmul.mubr.msk.f32.vlgmr.msra.gmra.mrb[4].mxu0 %vm635_vm7, %v4686_v55  ;;  %3827 = vmatmul.mubr.msk.f32.vlgmr.msra.gmra.mrb[4].mxu1 %vm635_vm7, %v4689_v56  ;;  %v440_v10 = vmul.f32 0.01, %v422_v7  ;;  %vm436_vm11 = vcmp.gt.f32.partialorder %v422_v7, 0.0 }
 0x127   :  { %3819 = vmatprep.mubr.msk.f32.mxu0 %vm635_vm7, %v4692_v58  ;;  %3829 = vmatprep.mubr.msk.f32.mxu1 %vm635_vm7, %v4696_v59  ;;  %v439_v11 = vmul.f32 0.01, %v417_v9  ;;  %v3801_v12 = vpop.f32.mrb[2].mxu0  ;;  %vm435_vm12 = vcmp.gt.f32.partialorder %v417_v9, 0.0 }
 0x128   :  { %3833 = vmatpush3.msk.msra.mxu0 %vm843_vm13, %v4679_v54  ;;  %v432_v13 = vadd.f32 %v3801_v12, %v3512_v3  ;;  %v426_v14 = vpop.f32.mrb[3].mxu0  ;;  %v444_v15 = vsel %vm436_vm11, %v422_v7, %v440_v10  ;;  %4138 = vmatpush3.bf16.msra.mxu1 %v4750_v24 }
 0x129   :  { %v427_v16 = vadd.f32 %v3512_v3, %v426_v14  ;;  %954 = vrot.lane.b32.xlu1 %v444_v15, %s4426_s0  ;;  %v443_v17 = vsel %vm435_vm12, %v417_v9, %v439_v11  ;;  %4140 = vmatprep.subr.bf16.mxu1 %v4756_v30 }
 0x12a   :  { %3820 = vmatmul.mubr.msk.f32.gmra.mrb[6].mxu0 %vm635_vm7, %v4711_v61  ;;  %3830 = vmatmul.mubr.msk.f32.gmra.mrb[6].mxu1 %vm635_vm7, %v4714_v62  ;;  %v442_v18 = vmul.f32 0.01, %v432_v13  ;;  %vm438_vm14 = vcmp.gt.f32.partialorder %v432_v13, 0.0 }
 0x12b   :  { %3834 = vmatprep.mubr.msk.f32.mxu0 %vm830_vm6, %v4717_v63  ;;  %952 = vrot.lane.b32.xlu0 %v443_v17, %s4426_s0  ;;  %v441_v19 = vmul.f32 0.01, %v427_v16  ;;  %vm437_vm15 = vcmp.gt.f32.partialorder %v427_v16, 0.0 }
 0x12c   :  { %v446_v20 = vsel %vm438_vm14, %v432_v13, %v442_v18  ;;  %4142 = vmatpush3.bf16.msra.mxu1 %v4756_v30  ;;  %4148 = vmatprep.subr.bf16.mxu0 %v4809_v25 }
 0x12d   :  { %958 = vrot.lane.b32.xlu1 %v446_v20, %s4426_s0  ;;  %v445_v21 = vsel %vm437_vm15, %v427_v16, %v441_v19  ;;  %4144 = vmatprep.subr.bf16.mxu1 %v4762_v34 }
 0x12e   :  { %3835 = vmatmul.mubr.msk.f32.vlgmr.msra.gmra.mrb[8].mxu0 %vm830_vm6, %v4728_v1 }
 0x12f   :  { %3837 = vmatprep.mubr.msk.f32.mxu0 %vm830_vm6, %v4731_v2  ;;  %956 = vrot.lane.b32.xlu0 %v445_v21, %s4426_s0 }
 0x130   :  { %4146 = vmatpush3.bf16.msra.mxu1 %v4762_v34  ;;  %4150 = vmatpush3.bf16.msra.mxu0 %v4809_v25 }
 0x131   :  { %3852 = vmatprep.subr.mxu1 %v4767_v35  ;;  %4152 = vmatprep.subr.bf16.mxu0 %v4815_v33 }
 0x132   :  { %3838 = vmatmul.mubr.msk.f32.gmra.mrb[10].mxu0 %vm830_vm6, %v4740_v4 }
 0x134   :  { %3853 = vmatpush3.msra.mxu1 %v4767_v35  ;;  %4154 = vmatpush3.bf16.msra.mxu0 %v4815_v33 }
 0x19b   :  { %v955_v49 = vpop.permute.xlu1 %954 }
 0x19d   :  { %v953_v51 = vpop.permute.xlu0 %952 }
 0x19f   :  { %v959_v52 = vpop.permute.xlu1 %958 }
 0x1a1   :  { %v957_v53 = vpop.permute.xlu0 %956 }
 0x1f9   :  { %v4771_v36 = vpop.f32.mrb[4].mxu0  ;;  %v3828_v37 = vpop.f32.mrb[4].mxu1 }
 0x1fa   :  { %v811_v38 = vpop.f32.mrb[5].mxu1  ;;  %938 = vrot.lane.b32.xlu1 %v3828_v37, %s4427_s5  ;;  %v4774_v39 = vpop.f32.mrb[5].mxu0  ;;  %v4820_v37 = vld [vmem:[%s5317_s17] ss:$0 sm:$0xff] }
 0x1fb   :  { %936 = vrot.lane.b32.xlu0 %v811_v38, %s4427_s5 }
 0x1fd   :  { %v4777_v40 = vpop.f32.mrb[6].mxu0  ;;  %v3831_v41 = vpop.f32.mrb[6].mxu1 }
 0x1fe   :  { %v821_v42 = vpop.f32.mrb[7].mxu1  ;;  %942 = vrot.lane.b32.xlu1 %v3831_v41, %s4427_s5  ;;  %v4780_v43 = vpop.f32.mrb[7].mxu0 }
 0x1ff   :  { %940 = vrot.lane.b32.xlu0 %v821_v42, %s4427_s5 }
 0x201   :  { %v3836_v44 = vpop.f32.mrb[8].mxu0 }
 0x202   :  { %970 = vrot.lane.b32.xlu1 %v3836_v44, %s4428_s9  ;;  %v913_v45 = vpop.f32.mrb[9].mxu0 }
 0x203   :  { %968 = vrot.lane.b32.xlu0 %v913_v45, %s4428_s9 }
 0x205   :  { %v3839_v47 = vpop.f32.mrb[10].mxu0 }
 0x206   :  { %974 = vrot.lane.b32.xlu1 %v3839_v47, %s4428_s9  ;;  %v923_v48 = vpop.f32.mrb[11].mxu0 }
 0x207   :  { %972 = vrot.lane.b32.xlu0 %v923_v48, %s4428_s9 }
 0x26c   :  { %v939_v57 = vpop.permute.xlu1 %938 }
 0x26d   :  { %v937_v60 = vpop.permute.xlu0 %936  ;;  %v981_v7 = vsel %vm635_vm7, %v4771_v36, %v939_v57 }
 0x26e   :  { %v980_v5 = vsel %vm635_vm7, %v4774_v39, %v937_v60  ;;  %v986_v12 = vsel %vm984_vm0, %v981_v7, %v955_v49  ;;  %v182_v7 = vld [vmem:[%s5318_s21] sm:$0xff] }
 0x26f   :  { %v985_v9 = vsel %vm984_vm0, %v980_v5, %v953_v51 }
 0x270   :  { %v943_v0 = vpop.permute.xlu1 %942 }
 0x271   :  { %v941_v3 = vpop.permute.xlu0 %940  ;;  %v983_v14 = vsel %vm635_vm7, %v4777_v40, %v943_v0 }
 0x272   :  { %v982_v11 = vsel %vm635_vm7, %v4780_v43, %v941_v3  ;;  %v988_v19 = vsel %vm984_vm0, %v983_v14, %v959_v52 }
 0x273   :  { %v987_v17 = vsel %vm984_vm0, %v982_v11, %v957_v53  ;;  %v185_v11 = vld [vmem:[%s5318_s21 + $0x18] sm:$0xff] }
 0x274   :  { %v971_v8 = vpop.permute.xlu1 %970 }
 0x275   :  { %v969_v10 = vpop.permute.xlu0 %968  ;;  %v991_v15 = vsel %vm989_vm1, %v986_v12, %v971_v8  ;;  %v183_v8 = vld [vmem:[%s5318_s21 + $0x8] sm:$0xff] }
 0x276   :  { %v990_v13 = vsel %vm989_vm1, %v985_v9, %v969_v10  ;;  %v184_v9 = vld [vmem:[%s5318_s21 + $0x10] sm:$0xff]  ;;  %v4833_v10 = vpack.c.bf16 %v183_v8, %v182_v7 }
 0x277   :  { %3854 = vmatprep.mubr.msk.f32.mxu1 %vm1000_vm2, %v990_v13  ;;  %v4836_v12 = vpack.c.bf16 %v185_v11, %v184_v9  ;;  %v4843_v13 = vld [vmem:[%s5319_s25] ss:$0 sm:$0xff] }
 0x278   :  { %v975_v16 = vpop.permute.xlu1 %974  ;;  %3855 = vmatmul.mubr.msk.f32.vlgmr.msra.gmra.mrb[8].mxu1 %vm1000_vm2, %v991_v15  ;;  %4156 = vmatprep.subr.bf16.mxu1 %v4833_v10 }
 0x279   :  { %v973_v18 = vpop.permute.xlu0 %972  ;;  %v993_v21 = vsel %vm989_vm1, %v988_v19, %v975_v16  ;;  %4158 = vmatpush3.bf16.msra.mxu1 %v4833_v10 }
 0x27a   :  { %v992_v20 = vsel %vm989_vm1, %v987_v17, %v973_v18  ;;  %4160 = vmatprep.subr.bf16.mxu1 %v4836_v12 }
 0x27b   :  { %3857 = vmatprep.mubr.msk.f32.mxu1 %vm1000_vm2, %v992_v20 }
 0x27c   :  { %3858 = vmatmul.mubr.msk.f32.gmra.mrb[10].mxu1 %vm1000_vm2, %v993_v21 }
 0x27d   :  { %4162 = vmatpush3.bf16.msra.mxu1 %v4836_v12 }
 0x34b   :  { %v3856_v38 = vpop.f32.mrb[8].mxu1 }
 0x34c   :  { %v1085_v41 = vadd.f32 %v3856_v38, %v4820_v37  ;;  %v1079_v42 = vpop.f32.mrb[9].mxu1 }
 0x34d   :  { %v1080_v44 = vadd.f32 %v4820_v37, %v1079_v42 }
 0x34e   :  { %v1103_v45 = vmul.f32 0.01, %v1085_v41  ;;  %vm1099_vm4 = vcmp.gt.f32.partialorder %v1085_v41, 0.0 }
 0x34f   :  { %vm1098_vm5 = vcmp.gt.f32.partialorder %v1080_v44, 0.0  ;;  %v1102_v47 = vmul.f32 0.01, %v1080_v44  ;;  %v3859_v48 = vpop.f32.mrb[10].mxu1 }
 0x350   :  { %v1095_v49 = vadd.f32 %v3859_v48, %v4820_v37  ;;  %v1089_v51 = vpop.f32.mrb[11].mxu1  ;;  %v1107_v57 = vsel %vm1099_vm4, %v1085_v41, %v1103_v45 }
 0x351   :  { %v1090_v52 = vadd.f32 %v4820_v37, %v1089_v51  ;;  %v1106_v53 = vsel %vm1098_vm5, %v1080_v44, %v1102_v47 }
 0x352   :  { %v1105_v60 = vmul.f32 0.01, %v1095_v49  ;;  %3868 = vmatprep.mubr.msk.f32.mxu0 %vm984_vm0, %v1106_v53  ;;  %vm1101_vm8 = vcmp.gt.f32.partialorder %v1095_v49, 0.0 }
 0x353   :  { %vm1100_vm9 = vcmp.gt.f32.partialorder %v1090_v52, 0.0  ;;  %v1104_v0 = vmul.f32 0.01, %v1090_v52  ;;  %3869 = vmatmul.mubr.msk.f32.vlgmr.msra.gmra.mrb[12].mxu0 %vm984_vm0, %v1107_v57 }
 0x354   :  { %v1109_v5 = vsel %vm1101_vm8, %v1095_v49, %v1105_v60 }
 0x355   :  { %v1108_v3 = vsel %vm1100_vm9, %v1090_v52, %v1104_v0 }
 0x356   :  { %3871 = vmatprep.mubr.msk.f32.mxu0 %vm984_vm0, %v1108_v3 }
 0x357   :  { %3872 = vmatmul.mubr.msk.f32.gmra.mrb[14].mxu0 %vm984_vm0, %v1109_v5 }
 0x426   :  { %v3870_v14 = vpop.f32.mrb[12].mxu0 }
 0x427   :  { %v4846_v15 = vadd.f32 %v3870_v14, %v4843_v13  ;;  %v1194_v16 = vpop.f32.mrb[13].mxu0 }
 0x428   :  { %v4849_v17 = vadd.f32 %v4843_v13, %v1194_v16 }
 0x429   :  { %1219 = vrot.lane.b32.xlu1 %v4846_v15, %s4427_s5 }
 0x42a   :  { %1217 = vrot.lane.b32.xlu0 %v4849_v17, %s4427_s5  ;;  %v3873_v18 = vpop.f32.mrb[14].mxu0 }
 0x42b   :  { %v4856_v19 = vadd.f32 %v3873_v18, %v4843_v13  ;;  %v1204_v20 = vpop.f32.mrb[15].mxu0 }
 0x42c   :  { %v4859_v21 = vadd.f32 %v4843_v13, %v1204_v20 }
 0x42d   :  { %1223 = vrot.lane.b32.xlu1 %v4856_v19, %s4427_s5 }
 0x42e   :  { %1221 = vrot.lane.b32.xlu0 %v4859_v21, %s4427_s5 }
 0x431   :  { %307 = vperm.xlu1 %4336, %v302_v22  }
 0x432   :  { %304 = vperm.xlu0 %4335, %v301_v23  }
 0x435   :  { %1436 = vperm.xlu1 %4336, %v321_v28  }
 0x436   :  { %1431 = vperm.xlu0 %4335, %v320_v31  }
 0x49b   :  { %v1220_v38 = vpop.permute.xlu1 %1219 }
 0x49c   :  { %v1218_v41 = vpop.permute.xlu0 %1217  ;;  %v1230_v44 = vsel %vm635_vm7, %v4771_v36, %v1220_v38  ;;  %v3510_v36 = vld [vmem:[%s5322_s30] ss:$0 sm:$0xff] }
 0x49d   :  { %v1229_v42 = vsel %vm635_vm7, %v4774_v39, %v1218_v41  ;;  %v4882_v39 = vshrl.u32 %v215_v26, 7 }
 0x49e   :  { %3882 = vmatprep.mubr.msk.f32.mxu1 %vm984_vm0, %v1229_v42 }
 0x49f   :  { %v1224_v45 = vpop.permute.xlu1 %1223  ;;  %3883 = vmatmul.mubr.msk.f32.vlgmr.msra.gmra.mrb[12].mxu1 %vm984_vm0, %v1230_v44  ;;  %vm273_vm10 = vcmp.eq.s32.totalorder %v4882_v39, %v3510_v36  ;;  %v267_v16 = vadd.s32 8, %v4882_v39  ;;  %v188_v44 = vld [vmem:[%s5324_s12 + $0x8] sm:$0xff] }
 0x4a0   :  { %v1222_v47 = vpop.permute.xlu0 %1221  ;;  %v1232_v49 = vsel %vm635_vm7, %v4777_v40, %v1224_v45  ;;  %v4887_v51 = vsel %vm273_vm10, 1.0, %v4423_v6  ;;  %v189_v45 = vld [vmem:[%s5324_s12 + $0x10] sm:$0xff] }
 0x4a1   :  { %v1231_v48 = vsel %vm635_vm7, %v4780_v43, %v1222_v47  ;;  %3896 = vmatprep.mubr.msk.f32.mxu0 %vm984_vm0, %v4887_v51  ;;  %v4892_v43 = vld [vmem:[%s5323_s6] ss:$0 sm:$0xff]  ;;  %vm274_vm4 = vcmp.eq.s32.totalorder %v267_v16, %v3510_v36 }
 0x4a2   :  { %3885 = vmatprep.mubr.msk.f32.mxu1 %vm984_vm0, %v1231_v48  ;;  %v4901_v38 = vsel %vm274_vm4, 1.0, %v4423_v6  ;;  %v190_v48 = vld [vmem:[%s5324_s12 + $0x18] sm:$0xff]  ;;  %v191_v36 = vld [vmem:[%s5324_s12 + $0x20] sm:$0xff] }
 0x4a3   :  { %3886 = vmatmul.mubr.msk.f32.gmra.mrb[14].mxu1 %vm984_vm0, %v1232_v49  ;;  %v4926_v49 = vpack.c.bf16 %v190_v48, %v189_v45 }
 0x4b0   :  { %v308_v31 = vpop.permute.xlu1 %307 }
 0x4b1   :  { %v305_v23 = vpop.permute.xlu0 %304  ;;  %vm310_vm8 = vcmp.eq.s32.totalorder %v4655_v27, %v308_v31 }
 0x4b2   :  { %vm309_vm5 = vcmp.eq.s32.totalorder %v4655_v27, %v305_v23  ;;  %v4916_v42 = vsel %vm310_vm8, 1.0, %v4423_v6  ;;  %v187_v27 = vld [vmem:[%s5324_s12] sm:$0xff] }
 0x4b3   :  { %v4907_v41 = vsel %vm309_vm5, 1.0, %v4423_v6  ;;  %v4923_v47 = vpack.c.bf16 %v188_v44, %v187_v27  ;;  %v4981_v44 = vld [vmem:[%s5327_s4] ss:$0 sm:$0xff] }
 0x4b5   :  { %4172 = vmatprep.subr.bf16.mxu1 %v4923_v47 }
 0x4b6   :  { %4174 = vmatpush3.bf16.msra.mxu1 %v4923_v47 }
 0x4b7   :  { %4176 = vmatprep.subr.bf16.mxu1 %v4926_v49 }
 0x4ba   :  { %4178 = vmatpush3.bf16.msra.mxu1 %v4926_v49 }
 0x572   :  { %v3884_v52 = vpop.f32.mrb[12].mxu1 }
 0x573   :  { %v1323_v40 = vadd.f32 %v3884_v52, %v4892_v43  ;;  %v1317_v53 = vpop.f32.mrb[13].mxu1  ;;  %v192_v52 = vld [vmem:[%s5324_s12 + $0x28] sm:$0xff] }
 0x574   :  { %v1318_v57 = vadd.f32 %v4892_v43, %v1317_v53  ;;  %v4939_v53 = vld [vmem:[%s5324_s12 + $0x30] sm:$0xff] }
 0x575   :  { %vm1337_vm11 = vcmp.gt.f32.partialorder %v1323_v40, 0.0  ;;  %v1341_v26 = vmul.f32 0.01, %v1323_v40 }
 0x576   :  { %vm1336_vm12 = vcmp.gt.f32.partialorder %v1318_v57, 0.0  ;;  %v1340_v60 = vmul.f32 0.01, %v1318_v57  ;;  %v3887_v0 = vpop.f32.mrb[14].mxu1 }
 0x577   :  { %v1333_v3 = vadd.f32 %v3887_v0, %v4892_v43  ;;  %v1327_v5 = vpop.f32.mrb[15].mxu1  ;;  %v1345_v7 = vsel %vm1337_vm11, %v1323_v40, %v1341_v26  ;;  %v4934_v40 = vpack.c.bf16 %v192_v52, %v191_v36 }
 0x578   :  { %v1328_v8 = vadd.f32 %v4892_v43, %v1327_v5  ;;  %v1344_v9 = vsel %vm1336_vm12, %v1318_v57, %v1340_v60  ;;  %v4943_v57 = vpop.permute.xlu1 %1436  ;;  %v4945_v60 = vpop.permute.xlu0 %1431  ;;  %vm1805_vm12 = vcmask 64512  }
 0x579   :  { %vm1339_vm14 = vcmp.gt.f32.partialorder %v1333_v3, 0.0  ;;  %v1343_v11 = vmul.f32 0.01, %v1333_v3  ;;  %v4163_v14 = vpack.c.bf16 %v1345_v7, %v1344_v9  ;;  %4180 = vmatprep.subr.bf16.mxu1 %v4934_v40  ;;  %v322_v9 = vld [vmem:[%s5325_s20] sm:$0x3] }
 0x57a   :  { %vm1338_vm15 = vcmp.gt.f32.partialorder %v1328_v8, 0.0  ;;  %v1342_v18 = vmul.f32 0.01, %v1328_v8  ;;  %4182 = vmatpush3.bf16.msra.mxu1 %v4934_v40 }
 0x57b   :  { %4164 = vmatprep.subr.bf16.mxu0 %v4163_v14  ;;  %v1347_v20 = vsel %vm1339_vm14, %v1333_v3, %v1343_v11  ;;  %3916 = vmatprep.subr.mxu1 %v4939_v53  ;;  %vm1813_vm14 = vcmask 195584  }
 0x57c   :  { %4166 = vmatpush3.bf16.msra.mxu0 %v4163_v14  ;;  %v1346_v22 = vsel %vm1338_vm15, %v1328_v8, %v1342_v18 }
 0x57d   :  { %v4167_v28 = vpack.c.bf16 %v1347_v20, %v1346_v22 }
 0x57e   :  { %3917 = vmatpush3.msra.mxu1 %v4939_v53 }
 0x57f   :  { %4168 = vmatprep.subr.bf16.mxu0 %v4167_v28 }
 0x580   :  { %4170 = vmatpush3.bf16.msra.mxu0 %v4167_v28  ;;  %v196_v28 = vld [vmem:[%s5326_s27 + $0x8] sm:$0xff] }
 0x581   :  { %3899 = vmatprep.subr.msk.mxu0 %vm843_vm13, %v4679_v54 }
 0x583   :  { %3897 = vmatmul.mubr.msk.f32.vlgmr.msra.gmra.mrb[16].mxu0 %vm984_vm0, %v4901_v38 }
 0x584   :  { %3900 = vmatpush3.msk.msra.mxu0 %vm843_vm13, %v4679_v54  ;;  %3901 = vmatprep.mubr.msk.f32.mxu0 %vm830_vm6, %v4907_v41 }
 0x587   :  { %3902 = vmatmul.mubr.msk.f32.vlgmr.msra.gmra.mrb[18].mxu0 %vm830_vm6, %v4916_v42 }
 0x656   :  { %v3898_v26 = vpop.f32.mrb[16].mxu0 }
 0x657   :  { %v1440_v0 = vmul.f32 %v3898_v26, %v4943_v57  ;;  %v1420_v3 = vpop.f32.mrb[17].mxu0 }
 0x658   :  { %v1439_v5 = vmul.f32 %v4945_v60, %v1420_v3 }
 0x659   :  { %1526 = vrot.lane.b32.xlu1 %v1440_v0, %s4427_s5 }
 0x65a   :  { %v3903_v7 = vpop.f32.mrb[18].mxu0  ;;  %1524 = vrot.lane.b32.xlu0 %v1439_v5, %s4427_s5 }
 0x65b   :  { %v1513_v8 = vpop.f32.mrb[19].mxu0 }
 0x65d   :  { %1534 = vrot.lane.b32.xlu1 %v3903_v7, %s4428_s9  ;;  %v200_v7 = vld [vmem:[%s5328_s16] sm:$0xff] }
 0x65e   :  { %1532 = vrot.lane.b32.xlu0 %v1513_v8, %s4428_s9  ;;  %v201_v8 = vld [vmem:[%s5328_s16 + $0x8] sm:$0xff] }
 0x662   :  { %1797 = vperm.xlu0 %4335, %v322_v9   ;;  %v4991_v9 = vpack.c.bf16 %v201_v8, %v200_v7 }
 0x666   :  { %2243 = vrot.lane.b32.xlu0 %v4849_v17, %s4426_s0 }
 0x66a   :  { %2247 = vrot.lane.b32.xlu0 %v4859_v21, %s4426_s0  ;;  %v195_v21 = vld [vmem:[%s5326_s27] sm:$0xff] }
 0x66b   :  { %v4970_v31 = vpack.c.bf16 %v196_v28, %v195_v21  ;;  %v204_v21 = vld [vmem:[%s5331_s22] sm:$0xff]  ;;  %v205_v28 = vld [vmem:[%s5331_s22 + $0x8] sm:$0xff] }
 0x66d   :  { %4184 = vmatprep.subr.bf16.mxu0 %v4970_v31 }
 0x66e   :  { %4186 = vmatpush3.bf16.msra.mxu0 %v4970_v31 }
 0x6cb   :  { %v1527_v11 = vpop.permute.xlu1 %1526 }
 0x6cc   :  { %v1525_v14 = vpop.permute.xlu0 %1524  ;;  %v1539_v22 = vsel %vm635_vm7, %v4671_v46, %v1527_v11  ;;  %v197_v46 = vld [vmem:[%s5326_s27 + $0x10] sm:$0xff]  ;;  %v4429_v11 = vmov 0.0|0.0  }
 0x6cd   :  { %v1538_v18 = vsel %vm635_vm7, %v4673_v50, %v1525_v14  ;;  %v198_v50 = vld [vmem:[%s5326_s27 + $0x18] sm:$0xff]  ;;  %4194 = vmatprep.subr.bf16.mxu1 %v4429_v11  ;;  %v4998_v14 = vld [vmem:[%s5328_s16 + $0x10] sm:$0xff] }
 0x6ce   :  { %v4976_v27 = vpack.c.bf16 %v198_v50, %v197_v46 }
 0x6cf   :  { %v1535_v16 = vpop.permute.xlu1 %1534 }
 0x6d0   :  { %v1533_v20 = vpop.permute.xlu0 %1532  ;;  %v1541_v17 = vsel %vm989_vm1, %v1539_v22, %v1535_v16  ;;  %4188 = vmatprep.subr.bf16.mxu0 %v4976_v27  ;;  %v5002_v16 = vld [vmem:[%s5329_s18] ss:$0 sm:$0xff] }
 0x6d1   :  { %v1540_v23 = vsel %vm989_vm1, %v1538_v18, %v1533_v20  ;;  %4190 = vmatpush3.bf16.msra.mxu0 %v4976_v27  ;;  %v3511_v20 = vld [vmem:[%s5330_s23] ss:$0 sm:$0xff] }
 0x6d2   :  { %3918 = vmatprep.mubr.msk.f32.mxu1 %vm1000_vm2, %v1540_v23  ;;  %4191 = vmatprep.subr.bf16.mxu0 %v4429_v11  ;;  %vm318_vm11 = vcmp.eq.s32.totalorder %v4882_v39, %v3511_v20 }
 0x6d3   :  { %3919 = vmatmul.mubr.msk.f32.vlgmr.msra.gmra.mrb[16].mxu1 %vm1000_vm2, %v1541_v17  ;;  %v5017_v50 = vsel %vm318_vm11, 1.0, %v4423_v6 }
 0x6d4   :  { %3945 = vmatprep.mubr.msk.f32.mxu1 %vm4424_vm3, %v4423_v6  ;;  %4196 = vmatpush3.bf16.msra.mxu1 %v4991_v9 }
 0x6d5   :  { %3943 = vmatprep.subr.mxu1 %v4423_v6 }
 0x6d8   :  { %3944 = vmatpush3.msra.mxu1 %v4998_v14 }
 0x7a6   :  { %v3920_v45 = vpop.f32.mrb[16].mxu1 }
 0x7a7   :  { %v1626_v48 = vadd.f32 %v3920_v45, %v4981_v44  ;;  %v1620_v36 = vpop.f32.mrb[17].mxu1  ;;  %v5019_v45 = vpack.c.bf16 %v205_v28, %v204_v21 }
 0x7a8   :  { %v1621_v52 = vadd.f32 %v4981_v44, %v1620_v36  ;;  %v207_v36 = vld [vmem:[%s5331_s22 + $0x18] sm:$0xff] }
 0x7a9   :  { %v1632_v26 = vmul.f32 0.01, %v1626_v48  ;;  %vm1630_vm9 = vcmp.gt.f32.partialorder %v1626_v48, 0.0 }
 0x7aa   :  { %vm1629_vm10 = vcmp.gt.f32.partialorder %v1621_v52, 0.0  ;;  %v1631_v0 = vmul.f32 0.01, %v1621_v52 }
 0x7ab   :  { %v1634_v5 = vsel %vm1630_vm9, %v1626_v48, %v1632_v26  ;;  %v206_v48 = vld [vmem:[%s5331_s22 + $0x10] sm:$0xff]  ;;  %v5033_v26 = vpop.permute.xlu0 %1797 }
 0x7ac   :  { %v1633_v3 = vsel %vm1629_vm10, %v1621_v52, %v1631_v0  ;;  %v5027_v52 = vpack.c.bf16 %v207_v36, %v206_v48 }
 0x7ad   :  { %3929 = vmatprep.mubr.msk.f32.mxu0 %vm984_vm0, %v1633_v3 }
 0x7ae   :  { %3930 = vmatmul.mubr.msk.f32.vlgmr.msra.gmra.mrb[20].mxu0 %vm984_vm0, %v1634_v5 }
 0x7af   :  { %3936 = vmatprep.mubr.msk.f32.mxu0 %vm4424_vm3, %v4423_v6  ;;  %v2244_v21 = vpop.permute.xlu0 %2243 }
 0x881   :  { %v3931_v18 = vpop.f32.mrb[20].mxu0 }
 0x882   :  { %v5006_v22 = vadd.f32 %v3931_v18, %v5002_v16  ;;  %v1713_v23 = vpop.f32.mrb[21].mxu0 }
 0x883   :  { %v5009_v17 = vadd.f32 %v5002_v16, %v1713_v23 }
 0x885   :  { %v4192_v46 = vpack.c.bf16 %v5006_v22, %v5009_v17 }
 0x887   :  { %4193 = vmatpush3.bf16.msra.mxu0 %v4192_v46  ;;  %4204 = vmatprep.subr.bf16.mxu1 %v4192_v46 }
 0x888   :  { %4197 = vmatprep.subr.bf16.mxu0 %v4429_v11 }
 0x88a   :  { %3937 = vmatmul.mubr.msk.f32.vlgmr.msra.gmra.mrb[22].mxu0 %vm635_vm7, %v5017_v50 }
 0x88b   :  { %4199 = vmatpush3.bf16.msra.mxu0 %v5019_v45  ;;  %3956 = vmatprep.mubr.msk.f32.mxu0 %vm4424_vm3, %v4423_v6 }
 0x88c   :  { %4200 = vmatprep.subr.bf16.mxu0 %v4429_v11 }
 0x88f   :  { %4202 = vmatpush3.bf16.msra.mxu0 %v5027_v52 }
 0x890   :  { %4208 = vmatprep.subr.bf16.mxu0 %v4192_v46 }
 0x95d   :  { %v1791_v0 = vpop.f32.mrb[22].mxu0 }
 0x95e   :  { %v1800_v3 = vmul.f32 %v5033_v26, %v1791_v0  ;;  %v3938_v5 = vpop.f32.mrb[23].mxu0 }
 0x960   :  { %1802 = vrot.lane.b32.xlu1 %v1800_v3, %s4430_s1 }
 0x964   :  { %2245 = vrot.lane.b32.xlu1 %v4846_v15, %s4426_s0  ;;  %v5055_v15 = vld [vmem:[%s5332_s26] ss:$0 sm:$0xff] }
 0x968   :  { %2249 = vrot.lane.b32.xlu1 %v4856_v19, %s4426_s0  ;;  %s4341_s0 = scalar_lea.vmem %s3451_s11, 32 }
 0x969   :  { %p4343_p2 = scmp.lt.s32.totalorder %s4341_s0, %s4337_s15 }
 0x96b   :  { %p4344_p3 = por %p4343_p2, %p4342_p1 }
 0x96d   :  { %p4345_p4 = pnand %p4344_p3, %p4338_p0 }
 0x9d2   :  { %v1803_v7 = vpop.permute.xlu1 %1802 }
 0x9d3   :  { %v1806_v8 = vsel %vm1805_vm12, %v4679_v54, %v1803_v7 }
 0x9d4   :  { %3946 = vmatmul.mubr.msk.f32.vlgmr.msra.gmra.mrb[18].mxu1 %vm1813_vm14, %v1806_v8 }
 0x9d5   :  { %4206 = vmatpush3.bf16.msra.mxu1 %v4192_v46  ;;  %3963 = vmatprep.mubr.msk.f32.mxu1 %vm635_vm7, %v4659_v29 }
 0x9d8   :  { %3964 = vmatmul.mubr.msk.f32.vlgmr.msra.gmra.mrb[20].mxu1 %vm635_vm7, %v4686_v55 }
 0x9d9   :  { %3966 = vmatprep.mubr.msk.f32.mxu1 %vm635_vm7, %v4692_v58 }
 0x9dc   :  { %3967 = vmatmul.mubr.msk.f32.gmra.mrb[22].mxu1 %vm635_vm7, %v4711_v61 }
 0x9dd   :  { %3981 = vmatprep.mubr.msk.f32.mxu1 %vm830_vm6, %v4717_v63 }
 0xaa7   :  { %v1883_v54 = vpop.f32.mrb[18].mxu1 }
 0xaa8   :  { %v1884_v19 = vadd.f32 %v5055_v15, %v1883_v54  ;;  %v3947_v18 = vpop.f32.mrb[19].mxu1 }
 0xaaa   :  { %vm1887_vm15 = vcmp.gt.f32.partialorder %v1884_v19, 0.0  ;;  %v1888_v29 = vmul.f32 0.01, %v1884_v19 }
 0xaab   :  { %v5058_v20 = vpop.f32.mrb[20].mxu1 }
 0xaac   :  { %v1889_v55 = vsel %vm1887_vm15, %v1884_v19, %v1888_v29  ;;  %v5060_v23 = vpop.f32.mrb[21].mxu1 }
 0xaad   :  { %3957 = vmatmul.mubr.msk.f32.vlgmr.msra.gmra.mrb[24].mxu0 %vm984_vm0, %v1889_v55 }
 0xaae   :  { %4210 = vmatpush3.bf16.msra.mxu0 %v4192_v46  ;;  %3973 = vmatprep.mubr.msk.f32.mxu0 %vm635_vm7, %v4665_v32  ;;  %v5084_v32 = vld [vmem:[%s5333_s28] ss:$0 sm:$0xff]  ;;  %v2248_v46 = vpop.permute.xlu0 %2247 }
 0xaaf   :  { %v5065_v58 = vpop.f32.mrb[22].mxu1  ;;  %4212 = vmatprep.subr.bf16.mxu0 %v4750_v24 }
 0xab0   :  { %v5068_v61 = vpop.f32.mrb[23].mxu1 }
 0xab1   :  { %3974 = vmatmul.mubr.msk.f32.vlgmr.msra.gmra.mrb[26].mxu0 %vm635_vm7, %v4689_v56 }
 0xab2   :  { %3976 = vmatprep.mubr.msk.f32.mxu0 %vm635_vm7, %v4696_v59  ;;  %4214 = vmatpush3.bf16.msra.mxu0 %v4750_v24 }
 0xab3   :  { %4216 = vmatprep.subr.bf16.mxu0 %v4756_v30 }
 0xab5   :  { %3977 = vmatmul.mubr.msk.f32.gmra.mrb[28].mxu0 %vm635_vm7, %v4714_v62 }
 0xab6   :  { %4218 = vmatpush3.bf16.msra.mxu0 %v4756_v30 }
 0xab7   :  { %4220 = vmatprep.subr.bf16.mxu0 %v4762_v34 }
 0xaba   :  { %4222 = vmatpush3.bf16.msra.mxu0 %v4762_v34 }
 0xabb   :  { %3999 = vmatprep.subr.mxu0 %v4767_v35 }
 0xabe   :  { %4000 = vmatpush3.msra.mxu0 %v4767_v35 }
 0xb80   :  { %v1965_v56 = vpop.f32.mrb[24].mxu0 }
 0xb81   :  { %v5087_v59 = vadd.f32 %v5084_v32, %v1965_v56  ;;  %v3958_v63 = vpop.f32.mrb[25].mxu0 }
 0xb83   :  { %3979 = vmatprep.subr.msk.mxu1 %vm843_vm13, %v5087_v59 }
 0xb84   :  { %v3975_v62 = vpop.f32.mrb[26].mxu0  ;;  %3980 = vmatpush3.msk.msra.mxu1 %vm843_vm13, %v5087_v59 }
 0xb85   :  { %3982 = vmatmul.mubr.msk.f32.vlgmr.msra.gmra.mrb[24].mxu1 %vm830_vm6, %v4728_v1  ;;  %2233 = vrot.lane.b32.xlu1 %v3975_v62, %s4427_s5  ;;  %v2120_v24 = vpop.f32.mrb[27].mxu0 }
 0xb86   :  { %3984 = vmatprep.mubr.msk.f32.mxu1 %vm830_vm6, %v4731_v2  ;;  %2231 = vrot.lane.b32.xlu0 %v2120_v24, %s4427_s5 }
 0xb87   :  { %4224 = vmatprep.subr.bf16.mxu1 %v4809_v25 }
 0xb88   :  { %v3978_v30 = vpop.f32.mrb[28].mxu0  ;;  %4226 = vmatpush3.bf16.msra.mxu1 %v4809_v25  ;;  %v2246_v25 = vpop.permute.xlu1 %2245 }
 0xb89   :  { %3985 = vmatmul.mubr.msk.f32.gmra.mrb[26].mxu1 %vm830_vm6, %v4740_v4  ;;  %2237 = vrot.lane.b32.xlu1 %v3978_v30, %s4427_s5  ;;  %v2130_v34 = vpop.f32.mrb[29].mxu0 }
 0xb8a   :  { %2235 = vrot.lane.b32.xlu0 %v2130_v34, %s4427_s5  ;;  %4228 = vmatprep.subr.bf16.mxu1 %v4815_v33 }
 0xb8c   :  { %4230 = vmatpush3.bf16.msra.mxu1 %v4815_v33  ;;  %v2250_v28 = vpop.permute.xlu1 %2249 }
 0xb8d   :  { %4232 = vmatprep.subr.bf16.mxu1 %v4833_v10 }
 0xbf7   :  { %v2234_v48 = vpop.permute.xlu1 %2233 }
 0xbf8   :  { %v2232_v33 = vpop.permute.xlu0 %2231  ;;  %v2272_v5 = vsel %vm635_vm7, %v5058_v20, %v2234_v48 }
 0xbf9   :  { %v2271_v3 = vsel %vm635_vm7, %v5060_v23, %v2232_v33  ;;  %v2276_v18 = vsel %vm984_vm0, %v2272_v5, %v2246_v25 }
 0xbfa   :  { %v2275_v8 = vsel %vm984_vm0, %v2271_v3, %v2244_v21 }
 0xbfb   :  { %v2238_v36 = vpop.permute.xlu1 %2237 }
 0xbfc   :  { %v2236_v0 = vpop.permute.xlu0 %2235  ;;  %v2274_v55 = vsel %vm635_vm7, %v5065_v58, %v2238_v36 }
 0xbfd   :  { %v2273_v19 = vsel %vm635_vm7, %v5068_v61, %v2236_v0  ;;  %v2278_v30 = vsel %vm984_vm0, %v2274_v55, %v2250_v28 }
 0xbfe   :  { %v2277_v62 = vsel %vm984_vm0, %v2273_v19, %v2248_v46 }
 0xc58   :  { %v3983_v1 = vpop.f32.mrb[24].mxu1 }
 0xc59   :  { %2261 = vrot.lane.b32.xlu1 %v3983_v1, %s4428_s9  ;;  %v2208_v2 = vpop.f32.mrb[25].mxu1 }
 0xc5a   :  { %2259 = vrot.lane.b32.xlu0 %v2208_v2, %s4428_s9 }
 0xc5c   :  { %v3986_v35 = vpop.f32.mrb[26].mxu1 }
 0xc5d   :  { %2265 = vrot.lane.b32.xlu1 %v3986_v35, %s4428_s9  ;;  %v2218_v4 = vpop.f32.mrb[27].mxu1 }
 0xc5e   :  { %2263 = vrot.lane.b32.xlu0 %v2218_v4, %s4428_s9 }
 0xccb   :  { %v2262_v7 = vpop.permute.xlu1 %2261 }
 0xccc   :  { %v2260_v54 = vpop.permute.xlu0 %2259  ;;  %v2280_v56 = vsel %vm989_vm1, %v2276_v18, %v2262_v7 }
 0xccd   :  { %v2279_v29 = vsel %vm989_vm1, %v2275_v8, %v2260_v54 }
 0xcce   :  { %4001 = vmatprep.mubr.msk.f32.mxu0 %vm1000_vm2, %v2279_v29 }
 0xccf   :  { %v2266_v63 = vpop.permute.xlu1 %2265  ;;  %4002 = vmatmul.mubr.msk.f32.vlgmr.msra.gmra.mrb[30].mxu0 %vm1000_vm2, %v2280_v56 }
 0xcd0   :  { %v2264_v24 = vpop.permute.xlu0 %2263  ;;  %v2282_v1 = vsel %vm989_vm1, %v2278_v30, %v2266_v63 }
 0xcd1   :  { %v2281_v34 = vsel %vm989_vm1, %v2277_v62, %v2264_v24 }
 0xcd2   :  { %4004 = vmatprep.mubr.msk.f32.mxu0 %vm1000_vm2, %v2281_v34 }
 0xcd3   :  { %4005 = vmatmul.mubr.msk.f32.gmra.mrb[32].mxu0 %vm1000_vm2, %v2282_v1 }
 0xcd4   :  { %4043 = vmatprep.mubr.msk.f32.mxu0 %vm984_vm0, %v4887_v51 }
 0xda2   :  { %v4003_v2 = vpop.f32.mrb[30].mxu0 }
 0xda3   :  { %v2367_v35 = vadd.f32 %v4003_v2, %v4820_v37  ;;  %v2361_v4 = vpop.f32.mrb[31].mxu0 }
 0xda4   :  { %v2362_v25 = vadd.f32 %v4820_v37, %v2361_v4 }
 0xda5   :  { %v2385_v21 = vmul.f32 0.01, %v2367_v35  ;;  %vm2381_vm4 = vcmp.gt.f32.partialorder %v2367_v35, 0.0 }
 0xda6   :  { %vm2380_vm5 = vcmp.gt.f32.partialorder %v2362_v25, 0.0  ;;  %v2384_v28 = vmul.f32 0.01, %v2362_v25  ;;  %v4006_v46 = vpop.f32.mrb[32].mxu0 }
 0xda7   :  { %v2377_v48 = vadd.f32 %v4006_v46, %v4820_v37  ;;  %v2371_v33 = vpop.f32.mrb[33].mxu0  ;;  %v2389_v3 = vsel %vm2381_vm4, %v2367_v35, %v2385_v21 }
 0xda8   :  { %v2372_v36 = vadd.f32 %v4820_v37, %v2371_v33  ;;  %v2388_v0 = vsel %vm2380_vm5, %v2362_v25, %v2384_v28 }
 0xda9   :  { %v2387_v5 = vmul.f32 0.01, %v2377_v48  ;;  %4015 = vmatprep.mubr.msk.f32.mxu1 %vm984_vm0, %v2388_v0  ;;  %vm2383_vm8 = vcmp.gt.f32.partialorder %v2377_v48, 0.0 }
 0xdaa   :  { %vm2382_vm9 = vcmp.gt.f32.partialorder %v2372_v36, 0.0  ;;  %v2386_v51 = vmul.f32 0.01, %v2372_v36  ;;  %4016 = vmatmul.mubr.msk.f32.vlgmr.msra.gmra.mrb[28].mxu1 %vm984_vm0, %v2389_v3 }
 0xdab   :  { %4234 = vmatpush3.bf16.msra.mxu1 %v4833_v10  ;;  %v2391_v8 = vsel %vm2383_vm8, %v2377_v48, %v2387_v5 }
 0xdac   :  { %v2390_v7 = vsel %vm2382_vm9, %v2372_v36, %v2386_v51  ;;  %4236 = vmatprep.subr.bf16.mxu1 %v4836_v12 }
 0xdad   :  { %4018 = vmatprep.mubr.msk.f32.mxu1 %vm984_vm0, %v2390_v7 }
 0xdae   :  { %4019 = vmatmul.mubr.msk.f32.gmra.mrb[30].mxu1 %vm984_vm0, %v2391_v8 }
 0xdaf   :  { %4238 = vmatpush3.bf16.msra.mxu1 %v4836_v12 }
 0xdb0   :  { %4248 = vmatprep.subr.bf16.mxu1 %v4923_v47 }
 0xe7d   :  { %v4017_v37 = vpop.f32.mrb[28].mxu1 }
 0xe7e   :  { %v5147_v54 = vadd.f32 %v4017_v37, %v4843_v13  ;;  %v2470_v19 = vpop.f32.mrb[29].mxu1 }
 0xe7f   :  { %v5150_v18 = vadd.f32 %v4843_v13, %v2470_v19 }
 0xe80   :  { %2495 = vrot.lane.b32.xlu1 %v5147_v54, %s4427_s5 }
 0xe81   :  { %v4280_v10 = vpack.c.bf16 %v5147_v54, %v5150_v18  ;;  %2493 = vrot.lane.b32.xlu0 %v5150_v18, %s4427_s5  ;;  %v4020_v12 = vpop.f32.mrb[30].mxu1 }
 0xe82   :  { %v5159_v29 = vadd.f32 %v4020_v12, %v4843_v13  ;;  %v2480_v55 = vpop.f32.mrb[31].mxu1 }
 0xe83   :  { %v5162_v56 = vadd.f32 %v4843_v13, %v2480_v55 }
 0xe84   :  { %2499 = vrot.lane.b32.xlu1 %v5159_v29, %s4427_s5 }
 0xe85   :  { %v4284_v63 = vpack.c.bf16 %v5159_v29, %v5162_v56  ;;  %2497 = vrot.lane.b32.xlu0 %v5162_v56, %s4427_s5 }
 0xef2   :  { %v2496_v62 = vpop.permute.xlu1 %2495 }
 0xef3   :  { %v2494_v24 = vpop.permute.xlu0 %2493  ;;  %v2506_v34 = vsel %vm635_vm7, %v5058_v20, %v2496_v62 }
 0xef4   :  { %v2505_v30 = vsel %vm635_vm7, %v5060_v23, %v2494_v24 }
 0xef5   :  { %4029 = vmatprep.mubr.msk.f32.mxu1 %vm984_vm0, %v2505_v30 }
 0xef6   :  { %v2500_v13 = vpop.permute.xlu1 %2499  ;;  %4030 = vmatmul.mubr.msk.f32.vlgmr.msra.gmra.mrb[32].mxu1 %vm984_vm0, %v2506_v34 }
 0xef7   :  { %v2498_v1 = vpop.permute.xlu0 %2497  ;;  %4250 = vmatpush3.bf16.msra.mxu1 %v4923_v47  ;;  %v2508_v35 = vsel %vm635_vm7, %v5065_v58, %v2500_v13 }
 0xef8   :  { %v2507_v2 = vsel %vm635_vm7, %v5068_v61, %v2498_v1  ;;  %4252 = vmatprep.subr.bf16.mxu1 %v4926_v49 }
 0xef9   :  { %4032 = vmatprep.mubr.msk.f32.mxu1 %vm984_vm0, %v2507_v2 }
 0xefa   :  { %4033 = vmatmul.mubr.msk.f32.gmra.mrb[34].mxu1 %vm984_vm0, %v2508_v35 }
 0xefb   :  { %4254 = vmatpush3.bf16.msra.mxu1 %v4926_v49 }
 0xefc   :  { %4256 = vmatprep.subr.bf16.mxu1 %v4934_v40 }
 0xeff   :  { %4258 = vmatpush3.bf16.msra.mxu1 %v4934_v40 }
 0xf00   :  { %4063 = vmatprep.subr.mxu1 %v4939_v53 }
 0xf03   :  { %4064 = vmatpush3.msra.mxu1 %v4939_v53 }
 0xf04   :  { %4267 = vmatprep.subr.bf16.mxu1 %v4429_v11 }
 0xfc9   :  { %v4031_v47 = vpop.f32.mrb[32].mxu1 }
 0xfca   :  { %v2593_v20 = vadd.f32 %v4031_v47, %v4892_v43  ;;  %v2587_v23 = vpop.f32.mrb[33].mxu1 }
 0xfcb   :  { %v2588_v58 = vadd.f32 %v4892_v43, %v2587_v23 }
 0xfcc   :  { %vm2607_vm10 = vcmp.gt.f32.partialorder %v2593_v20, 0.0  ;;  %v2611_v61 = vmul.f32 0.01, %v2593_v20 }
 0xfcd   :  { %vm2606_vm11 = vcmp.gt.f32.partialorder %v2588_v58, 0.0  ;;  %v2610_v49 = vmul.f32 0.01, %v2588_v58  ;;  %v4034_v4 = vpop.f32.mrb[34].mxu1 }
 0xfce   :  { %v2603_v25 = vadd.f32 %v4034_v4, %v4892_v43  ;;  %v2597_v40 = vpop.f32.mrb[35].mxu1  ;;  %v2615_v21 = vsel %vm2607_vm10, %v2593_v20, %v2611_v61  ;;  %v214_v20 = vld [vmem:[#allocation3] sm:$0x1] }
 0xfcf   :  { %v2598_v28 = vadd.f32 %v4892_v43, %v2597_v40  ;;  %v2614_v53 = vsel %vm2606_vm11, %v2588_v58, %v2610_v49 }
 0xfd0   :  { %vm2609_vm15 = vcmp.gt.f32.partialorder %v2603_v25, 0.0  ;;  %v2613_v46 = vmul.f32 0.01, %v2603_v25  ;;  %v4239_v48 = vpack.c.bf16 %v2615_v21, %v2614_v53 }
 0xfd1   :  { %vm2608_vm4 = vcmp.gt.f32.partialorder %v2598_v28, 0.0  ;;  %v2612_v33 = vmul.f32 0.01, %v2598_v28 }
 0xfd2   :  { %4240 = vmatprep.subr.bf16.mxu0 %v4239_v48  ;;  %v2617_v36 = vsel %vm2609_vm15, %v2603_v25, %v2613_v46  ;;  %v213_v46 = vld [vmem:[%s4614_s8] sm:$0x1] }
 0xfd3   :  { %4242 = vmatpush3.bf16.msra.mxu0 %v4239_v48  ;;  %v2616_v0 = vsel %vm2608_vm4, %v2598_v28, %v2612_v33 }
 0xfd4   :  { %v4243_v3 = vpack.c.bf16 %v2617_v36, %v2616_v0 }
 0xfd6   :  { %4244 = vmatprep.subr.bf16.mxu0 %v4243_v3 }
 0xfd7   :  { %4246 = vmatpush3.bf16.msra.mxu0 %v4243_v3 }
 0xfd8   :  { %4046 = vmatprep.subr.msk.mxu0 %vm843_vm13, %v5087_v59 }
 0xfda   :  { %4044 = vmatmul.mubr.msk.f32.vlgmr.msra.gmra.mrb[34].mxu0 %vm984_vm0, %v4901_v38 }
 0xfdb   :  { %4047 = vmatpush3.msk.msra.mxu0 %vm843_vm13, %v5087_v59  ;;  %4048 = vmatprep.mubr.msk.f32.mxu0 %vm830_vm6, %v4907_v41 }
 0xfdc   :  { %4260 = vmatprep.subr.bf16.mxu0 %v4970_v31 }
 0xfde   :  { %4049 = vmatmul.mubr.msk.f32.vlgmr.msra.gmra.mrb[36].mxu0 %vm830_vm6, %v4916_v42 }
 0xfdf   :  { %4262 = vmatpush3.bf16.msra.mxu0 %v4970_v31  ;;  %v210_v31 = vld [vmem:[#allocation2] sm:$0x1] }
 0xfe0   :  { %4264 = vmatprep.subr.bf16.mxu0 %v4976_v27 }
 0xfe3   :  { %4266 = vmatpush3.bf16.msra.mxu0 %v4976_v27 }
 0xfe4   :  { %4270 = vmatprep.subr.bf16.mxu0 %v4429_v11 }
0x10ad   :  { %v4045_v43 = vpop.f32.mrb[34].mxu0 }
0x10ae   :  { %v2694_v38 = vmul.f32 %v4045_v43, %v4943_v57  ;;  %v2684_v5 = vpop.f32.mrb[35].mxu0 }
0x10af   :  { %v2693_v51 = vmul.f32 %v2684_v5, %v4945_v60 }
0x10b0   :  { %2774 = vrot.lane.b32.xlu1 %v2694_v38, %s4427_s5 }
0x10b1   :  { %v4050_v41 = vpop.f32.mrb[36].mxu0  ;;  %2772 = vrot.lane.b32.xlu0 %v2693_v51, %s4427_s5 }
0x10b2   :  { %v2761_v42 = vpop.f32.mrb[37].mxu0 }
0x10b4   :  { %2782 = vrot.lane.b32.xlu1 %v4050_v41, %s4428_s9 }
0x10b5   :  { %2780 = vrot.lane.b32.xlu0 %v2761_v42, %s4428_s9 }
0x10b8   :  { %3185 = vperm.xlu1 %4336, %v210_v31  }
0x1122   :  { %v2775_v27 = vpop.permute.xlu1 %2774 }
0x1123   :  { %v2773_v7 = vpop.permute.xlu0 %2772  ;;  %v2787_v60 = vsel %vm635_vm7, %v5006_v22, %v2775_v27 }
0x1124   :  { %v2786_v57 = vsel %vm635_vm7, %v5009_v17, %v2773_v7 }
0x1126   :  { %v2783_v8 = vpop.permute.xlu1 %2782 }
0x1127   :  { %v2781_v37 = vpop.permute.xlu0 %2780  ;;  %v2789_v12 = vsel %vm989_vm1, %v2787_v60, %v2783_v8 }
0x1128   :  { %v2788_v19 = vsel %vm989_vm1, %v2786_v57, %v2781_v37  ;;  %vm4281_vm1 = vmpackc.low %vm635_vm7, %vm635_vm7 }
0x1129   :  { %4065 = vmatprep.mubr.msk.f32.mxu1 %vm1000_vm2, %v2788_v19 }
0x112a   :  { %4066 = vmatmul.mubr.msk.f32.vlgmr.msra.gmra.mrb[36].mxu1 %vm1000_vm2, %v2789_v12 }
0x112b   :  { %4083 = vmatprep.mubr.msk.f32.mxu1 %vm4424_vm3, %v4423_v6 }
0x11fd   :  { %v4067_v55 = vpop.f32.mrb[36].mxu1 }
0x11fe   :  { %v2868_v62 = vadd.f32 %v4067_v55, %v4981_v44  ;;  %v2862_v24 = vpop.f32.mrb[37].mxu1 }
0x11ff   :  { %v2863_v17 = vadd.f32 %v4981_v44, %v2862_v24 }
0x1200   :  { %v2874_v30 = vmul.f32 0.01, %v2868_v62  ;;  %vm2872_vm13 = vcmp.gt.f32.partialorder %v2868_v62, 0.0 }
0x1201   :  { %vm2871_vm6 = vcmp.gt.f32.partialorder %v2863_v17, 0.0  ;;  %v2873_v22 = vmul.f32 0.01, %v2863_v17 }
0x1202   :  { %v2876_v13 = vsel %vm2872_vm13, %v2868_v62, %v2874_v30 }
0x1203   :  { %v2875_v34 = vsel %vm2871_vm6, %v2863_v17, %v2873_v22 }
0x1204   :  { %4076 = vmatprep.mubr.msk.f32.mxu0 %vm984_vm0, %v2875_v34 }
0x1205   :  { %4077 = vmatmul.mubr.msk.f32.vlgmr.msra.gmra.mrb[38].mxu0 %vm984_vm0, %v2876_v13 }
0x1206   :  { %4272 = vmatpush3.bf16.msra.mxu0 %v4991_v9  ;;  %4092 = vmatprep.mubr.msk.f32.mxu0 %vm4424_vm3, %v4423_v6 }
0x1207   :  { %4090 = vmatprep.subr.mxu0 %v4423_v6 }
0x120a   :  { %4091 = vmatpush3.msra.mxu0 %v4998_v14 }
0x120b   :  { %4279 = vmatprep.subr.bf16.mxu0 %v4429_v11 }
0x12d8   :  { %v4078_v44 = vpop.f32.mrb[38].mxu0 }
0x12d9   :  { %v2955_v1 = vadd.f32 %v4078_v44, %v5002_v16  ;;  %v2949_v2 = vpop.f32.mrb[39].mxu0 }
0x12da   :  { %v2950_v35 = vadd.f32 %v5002_v16, %v2949_v2 }
0x12dc   :  { %v4268_v47 = vpack.c.bf16 %v2955_v1, %v2950_v35 }
0x12de   :  { %4269 = vmatpush3.bf16.msra.mxu1 %v4268_v47 }
0x12df   :  { %4273 = vmatprep.subr.bf16.mxu1 %v4429_v11 }
0x12e1   :  { %4084 = vmatmul.mubr.msk.f32.vlgmr.msra.gmra.mrb[38].mxu1 %vm635_vm7, %v5017_v50 }
0x12e2   :  { %4275 = vmatpush3.bf16.msra.mxu1 %v5019_v45  ;;  %4103 = vmatprep.mubr.msk.f32.mxu1 %vm4424_vm3, %v4423_v6 }
0x12e3   :  { %4276 = vmatprep.subr.bf16.mxu1 %v4429_v11 }
0x12e6   :  { %4278 = vmatpush3.bf16.msra.mxu1 %v5027_v52  ;;  %v209_v52 = vld [vmem:[%s5334_s2] sm:$0x1] }
0x12e7   :  { %4117 = vmatprep.subr.mxu1 %v4423_v6 }
0x13b4   :  { %v3024_v9 = vpop.f32.mrb[38].mxu1 }
0x13b5   :  { %v3028_v14 = vmul.f32 %v3024_v9, %v5033_v26  ;;  %v4085_v16 = vpop.f32.mrb[39].mxu1 }
0x13b7   :  { %3030 = vrot.lane.b32.xlu0 %v3028_v14, %s4430_s1 }
0x13bb   :  { %3359 = vperm.xlu0 %4335, %v214_v20  }
0x1429   :  { %v3031_v50 = vpop.permute.xlu0 %3030 }
0x142a   :  { %v3033_v45 = vsel %vm1805_vm12, %v5087_v59, %v3031_v50 }
0x142b   :  { %4093 = vmatmul.mubr.msk.f32.vlgmr.msra.gmra.mrb[40].mxu0 %vm1813_vm14, %v3033_v45  ;;  %vm3273_vm14 = vcmask 253952  }
0x142c   :  { %4282 = vmatpush3.bf16.xpose.msk.msra.mxu0 %vm4281_vm1, %v4280_v10  ;;  %4114 = vmatprep.mubr.msk.f32.mxu0 %vm4424_vm3, %v4423_v6  ;;  %v3186_v10 = vpop.permute.xlu1 %3185 }
0x142d   :  { %4283 = vmatprep.subr.bf16.mxu0 %v4429_v11  ;;  %v3190_v11 = vsub.s32 0, %v4882_v39  ;;  %v3611_v39 = vld [vmem:[%s4609_s3] ss:$0 sm:$0xff] }
0x142f   :  { %v3191_v29 = vrot.slane %v3186_v10, %v3190_v11 }
0x1434   :  { %4286 = vmatpush3.bf16.xpose.msk.msra.mxu0 %vm4281_vm1, %v4284_v63 }
0x143b   :  { %4115 = vmatmul.mubr.msk.f32.vlgmr.msra.gmra.mrb[42].mxu0 %vm635_vm7, %v209_v52 }
0x14fe   :  { %v3103_v26 = vpop.f32.mrb[40].mxu0 }
0x14ff   :  { %v3104_v59 = vadd.f32 %v5055_v15, %v3103_v26  ;;  %v4094_v23 = vpop.f32.mrb[41].mxu0  ;;  %v211_v15 = vld [vmem:[%s5335_s10] sm:$0xff] }
0x1501   :  { %vm3107_vm2 = vcmp.gt.f32.partialorder %v3104_v59, 0.0  ;;  %v3108_v54 = vmul.f32 0.01, %v3104_v59 }
0x1503   :  { %v3109_v18 = vsel %vm3107_vm2, %v3104_v59, %v3108_v54 }
0x1504   :  { %4104 = vmatmul.mubr.msk.f32.vlgmr.msra.gmra.mrb[40].mxu1 %vm984_vm0, %v3109_v18 }
0x1505   :  { %4119 = vmatprep.mubr.msk.f32.mxu1 %vm4424_vm3, %v4423_v6  ;;  %4118 = vmatpush3.msra.mxu1 %v211_v15 }
0x1506   :  { %4122 = vmatprep.subr.mxu1 %v4423_v6 }
0x150e   :  { %v3269_v56 = vpop.f32.mrb[42].mxu0 }
0x150f   :  { %v3270_v63 = vadd.f32 %v3269_v56, %v3191_v29  ;;  %v4116_v58 = vpop.f32.mrb[43].mxu0 }
0x1511   :  { %3274 = vst.msk [vmem:[#allocation4] sm:$0x1] %vm3273_vm14, %v3270_v63 }
0x15d7   :  { %v3179_v61 = vpop.f32.mrb[40].mxu1 }
0x15d8   :  { %v3180_v49 = vadd.f32 %v5084_v32, %v3179_v61  ;;  %v4105_v4 = vpop.f32.mrb[41].mxu1 }
0x15da   :  { %4120 = vmatmul.mubr.msk.f32.vlgmr.msra.gmra.mrb[42].mxu1 %vm1805_vm12, %v3180_v49 }
0x15db   :  { %4124 = vmatprep.mubr.msk.f32.mxu1 %vm4424_vm3, %v4423_v6 }
0x16ad   :  { %v3350_v25 = vpop.f32.mrb[42].mxu1 }
0x16ae   :  { %v3351_v40 = vadd.f32 %v3611_v39, %v3350_v25  ;;  %v4121_v21 = vpop.f32.mrb[43].mxu1 }
0x16b0   :  { %vm3354_vm0 = vcmp.gt.f32.partialorder %v3351_v40, 0.0  ;;  %v3355_v28 = vmul.f32 0.01, %v3351_v40 }
0x16b2   :  { %v3356_v53 = vsel %vm3354_vm0, %v3351_v40, %v3355_v28 }
0x16b3   :  { %4123 = vmatpush3.xpose.msk.msra.mxu1 %vm635_vm7, %v3356_v53 }
0x16b6   :  { %4125 = vmatmul.mubr.msk.f32.vlgmr.msra.gmra.mrb[44].mxu1 %vm635_vm7, %v213_v46 }
0x16b7   :  { %4348 = shalt.err (!%p4345_p4)
}
0x16b8   :  { %s4349_s3 = scalar_lea.hbm %s4619_s19, 16 }
0x16b9   :  { %p4350_p5 = scmp.ne.s32.totalorder %s4619_s19, %s4349_s3  ;;  %p4353_p6 = scmp.lt.u32.totalorder %s4349_s3, %s4619_s19 }
0x16bb   :  { %p4355_p7 = pnand %p4353_p6, %p4350_p5 }
0x16bd   :  { %4358 = shalt.err (!%p4355_p7)
}
0x16be   :  { %3453 = dma.vmem_to_hbm [thread:$0]  %s3451_s11, 16, %s4619_s19, [#allocation5]   ;;  %v3360_v6 = vpop.permute.xlu0 %3359  ;;  %vm3442_vm3 = vcmask 8192  }
0x16bf   :  { %s4432_s8 = smov [#allocation6]   ;;  %v3365_v32 = vrot.slane %v3360_v6, %v3190_v11 }
0x16c0   :  { %s3460_s5 = sshll.u32 %s4432_s8, 4  ;;  %s3461_s5 = int_to_ptr.vmem [resolvable:$true] %s3460_s5 }
0x16c1   :  { %s4359_s9 = scalar_lea.vmem %s3461_s5, 16  ;;  %s4363_s13 = scalar_lea.vmem %s3461_s5, 32 }
0x16c2   :  { %p4360_p8 = scmp.ne.s32.totalorder %s3461_s5, %s4359_s9  ;;  %p4364_p9 = scmp.lt.s32.totalorder %s3461_s5, %s3461_s5 }
0x16c3   :  { %p4365_p10 = scmp.lt.s32.totalorder %s4363_s13, %s4359_s9 }
0x16c5   :  { %p4366_p11 = por %p4365_p10, %p4364_p9 }
0x16c7   :  { %p4367_p12 = pnand %p4366_p11, %p4360_p8 }
0x1789   :  { %v3438_v48 = vpop.f32.mrb[44].mxu1 }
0x178a   :  { %v3439_v33 = vadd.f32 %v3438_v48, %v3365_v32  ;;  %v4126_v36 = vpop.f32.mrb[45].mxu1 }
0x178c   :  { %3443 = vst.msk [vmem:[#allocation6] sm:$0x1] %vm3442_vm3, %v3439_v33 }
0x178d   :  { %4370 = shalt.err (!%p4367_p12)
}
0x178e   :  { %s4371_s19 = scalar_lea.hbm %s4624_s14, 16 }
0x178f   :  { %p4372_p13 = scmp.ne.s32.totalorder %s4624_s14, %s4371_s19  ;;  %p4375_p0 = scmp.lt.u32.totalorder %s4371_s19, %s4624_s14 }
0x1791   :  { %p4377_p1 = pnand %p4375_p0, %p4372_p13 }
0x1793   :  { %4380 = shalt.err (!%p4377_p1)
}
0x1794   :  { %3463 = dma.vmem_to_hbm [thread:$0]  %s3461_s5, 16, %s4624_s14, [#allocation7]  }
0x1795   :  { %4381 = dma.done.wait [#allocation5], 16  }
0x1796   :  { %4382 = vsyncadd [#allocation5], 4294967280 }
0x1797   :  { %4383 = dma.done.wait [#allocation7], 16  }
0x1798   :  { %4384 = vsyncadd [#allocation7], 4294967280 }
0x1799   :  { %3470 = vsyncpa [#allocation5], 1 }
0x179a   :  { %3471 = vsyncpa [#allocation7], 1 }

</bundles_post_ra>
